<compile_context>
chip_gen: v5e
topology: v5e:2x2
jax: 0.10.0
libtpu: 0.0.40
codegen_flags: <defaults>
</compile_context>

<pallas_src>
import jax
import jax.numpy as jnp
from jax import lax
from jax.experimental import pallas as pl
from jax.experimental.pallas import tpu as pltpu

LN_EPS = 1e-5


def _vmem_limit_bytes():
    # Budget ~3/4 of physical VMEM: ~96 MiB on v5e/v6e (128 MiB), ~48 MiB on v7x (64 MiB).
    try:
        cap = pltpu.get_tpu_info().vmem_capacity_bytes
    except Exception:
        cap = 64 * 1024 * 1024
    return max(32 * 1024 * 1024, int(cap) * 3 // 4)


VMEM_LIMIT = _vmem_limit_bytes()


def _pick_tile(dim, pref, align):
    """Largest divisor of `dim` <= pref that is a multiple of `align`; falls back
    to the full dim (full-dim blocks are always legal)."""
    if dim <= pref:
        return dim
    for t in range(pref, 0, -1):
        if dim % t == 0 and t % align == 0:
            return t
    # TODO(synk): for awkward large dims this falls back to a full-dim block,
    # which can exceed the VMEM budget; pad such shapes upstream if hit.
    return dim


def _pick_time_chunk(T, pref=16):
    """Time chunk: multiple of 8 (sublane constraint) and <= `pref` so the static
    unroll inside the serial kernel stays small (bounded vreg pressure / code size)."""
    if T <= pref:
        return T
    for t in range(pref, 7, -1):
        if T % t == 0 and t % 8 == 0:
            return t
    return T


def _pick_batch_block(B):
    """Two batch blocks (one per v7x TensorCore) when the (8,·) sublane constraint on
    the (Bt,H) hidden-state blocks allows it; otherwise a single block."""
    if B % 2 == 0 and (B // 2) % 8 == 0:
        return B // 2
    return B


# ---------------------------------------------------------------------------
# Tiled matmul + bias:  (M, K) @ (K, N) + (1, N) -> (M, N)
# K-tiled with an f32 VMEM accumulator; MXU operands cast to bf16.
# ---------------------------------------------------------------------------
def _matmul_bias_kernel(x_ref, w_ref, b_ref, o_ref, acc_ref):
    k = pl.program_id(2)

    @pl.when(k == 0)
    def _():
        acc_ref[...] = jnp.zeros_like(acc_ref)

    acc_ref[...] += jnp.dot(
        x_ref[...].astype(jnp.bfloat16),
        w_ref[...].astype(jnp.bfloat16),
        preferred_element_type=jnp.float32,
    )

    @pl.when(k == pl.num_programs(2) - 1)
    def _():
        o_ref[...] = (acc_ref[...] + b_ref[...].astype(jnp.float32)).astype(o_ref.dtype)


def matmul_bias(x, w, b, *, out_dtype=jnp.float32,
                tm_pref=256, tn_pref=512, tk_pref=512):
    M, K = x.shape
    K2, N = w.shape
    assert K == K2
    tm = _pick_tile(M, tm_pref, 8)
    tn = _pick_tile(N, tn_pref, 128)
    tk = _pick_tile(K, tk_pref, 128)
    grid = (M // tm, N // tn, K // tk)
    return pl.pallas_call(
        _matmul_bias_kernel,
        grid_spec=pltpu.PrefetchScalarGridSpec(
            num_scalar_prefetch=0,
            grid=grid,
            in_specs=[
                pl.BlockSpec((tm, tk), lambda i, j, k: (i, k)),
                pl.BlockSpec((tk, tn), lambda i, j, k: (k, j)),
                pl.BlockSpec((1, tn), lambda i, j, k: (0, j)),
            ],
            out_specs=pl.BlockSpec((tm, tn), lambda i, j, k: (i, j)),
            scratch_shapes=[pltpu.VMEM((tm, tn), jnp.float32)],
        ),
        out_shape=jax.ShapeDtypeStruct((M, N), out_dtype),
        compiler_params=pltpu.CompilerParams(
            dimension_semantics=("parallel", "parallel", "arbitrary"),
            vmem_limit_bytes=VMEM_LIMIT,
        ),
    )(x, w, b.reshape(1, N))


# ---------------------------------------------------------------------------
# Serial GRU recurrence.  Grid = (batch blocks [parallel], time chunks [arbitrary]).
# gi_r/gi_z/gi_n arrive precomputed (input projections + folded biases), so only
# h @ W_h* + gate math sits on the serial dependency chain.
# ---------------------------------------------------------------------------
def _gru_kernel(gi_r_ref, gi_z_ref, gi_n_ref, h0_ref,
                whr_ref, whz_ref, whn_ref, bhn_ref,
                hraw_ref, hidden_ref, h_scratch):
    c = pl.program_id(1)
    Tc = gi_r_ref.shape[1]

    @pl.when(c == 0)
    def _():
        # Time axis restarts for every batch block: (re-)load h0 for this block.
        h_scratch[...] = h0_ref[...].astype(jnp.float32)

    whr = whr_ref[...]                      # bf16 (H, H)
    whz = whz_ref[...]
    whn = whn_ref[...]
    bhn = bhn_ref[...].astype(jnp.float32)  # (1, H)

    h = h_scratch[...]                      # (Bt, H) f32 carry
    # Static unroll over a modest time chunk; per-timestep ref reads keep only one
    # timestep of gi live, so vreg pressure stays bounded.
    for i in range(Tc):
        hb = h.astype(jnp.bfloat16)
        gr = jnp.dot(hb, whr, preferred_element_type=jnp.float32)
        gz = jnp.dot(hb, whz, preferred_element_type=jnp.float32)
        gn = jnp.dot(hb, whn, preferred_element_type=jnp.float32) + bhn
        # PyTorch GRU: r/z biases are folded into gi_r/gi_z; only b_hn stays inside
        # the r-gated term.
        r = jax.nn.sigmoid(gi_r_ref[:, i, :].astype(jnp.float32) + gr)
        z = jax.nn.sigmoid(gi_z_ref[:, i, :].astype(jnp.float32) + gz)
        n = jnp.tanh(gi_n_ref[:, i, :].astype(jnp.float32) + r * gn)
        h = n + z * (h - n)                 # == (1 - z) * n + z * h
        hraw_ref[:, i, :] = h.astype(hraw_ref.dtype)

    h_scratch[...] = h

    @pl.when(c == pl.num_programs(1) - 1)
    def _():
        hidden_ref[...] = h.astype(hidden_ref.dtype)


# ---------------------------------------------------------------------------
# skip-add + LayerNorm as a parallel elementwise pass (hoisted off the recurrence).
# ---------------------------------------------------------------------------
def _add_ln_kernel(h_ref, s_ref, g_ref, b_ref, o_ref):
    o = h_ref[...].astype(jnp.float32) + s_ref[...].astype(jnp.float32)
    mu = jnp.mean(o, axis=-1, keepdims=True)
    var = jnp.mean(jnp.square(o - mu), axis=-1, keepdims=True)
    o_ref[...] = ((o - mu) * lax.rsqrt(var + LN_EPS)
                  * g_ref[...].astype(jnp.float32)
                  + b_ref[...].astype(jnp.float32)).astype(o_ref.dtype)


def add_layernorm(h, s, gamma, beta, *, tm_pref=512):
    M, H = h.shape
    tm = _pick_tile(M, tm_pref, 8)
    return pl.pallas_call(
        _add_ln_kernel,
        grid_spec=pltpu.PrefetchScalarGridSpec(
            num_scalar_prefetch=0,
            grid=(M // tm,),
            in_specs=[
                pl.BlockSpec((tm, H), lambda i: (i, 0)),
                pl.BlockSpec((tm, H), lambda i: (i, 0)),
                pl.BlockSpec((1, H), lambda i: (0, 0)),
                pl.BlockSpec((1, H), lambda i: (0, 0)),
            ],
            out_specs=pl.BlockSpec((tm, H), lambda i: (i, 0)),
        ),
        out_shape=jax.ShapeDtypeStruct((M, H), jnp.float32),
        compiler_params=pltpu.CompilerParams(
            dimension_semantics=("parallel",),
            vmem_limit_bytes=VMEM_LIMIT,
        ),
    )(h, s, gamma.reshape(1, H), beta.reshape(1, H))


# ---------------------------------------------------------------------------
# Forward pass.
# ---------------------------------------------------------------------------
@jax.jit
def first_model_forward(tokens, prepared, hidden=None):
    """tokens: (B, T) int32.  Returns (logits (B,T,V), out (B,T,H), hidden_new (1,B,H))."""
    emb = prepared["embedding"]               # (V, E) f32
    B, T = tokens.shape
    V, E = emb.shape
    H = prepared["w_hr_t"].shape[0]

    # Embedding gather (plain-JAX glue; stays batch-major).
    x = jnp.take(emb, tokens, axis=0).reshape(B * T, E)
    x_bf = x.astype(jnp.bfloat16)

    # Batched input-side projections for ALL timesteps -- off the serial path.
    # TODO(synk): store gi_* in bf16 once packed sublane-row slicing in the serial
    # kernel is verified on the target toolchain; f32 kept for lowering robustness.
    gi_r = matmul_bias(x_bf, prepared["w_ir_t"], prepared["b_r"]).reshape(B, T, H)
    gi_z = matmul_bias(x_bf, prepared["w_iz_t"], prepared["b_z"]).reshape(B, T, H)
    gi_n = matmul_bias(x_bf, prepared["w_in_t"], prepared["b_in"]).reshape(B, T, H)
    skip = matmul_bias(x_bf, prepared["w_skip_t"], prepared["b_skip"],
                       out_dtype=jnp.bfloat16)            # (B*T, H), bf16 stream

    if hidden is None:
        h0 = jnp.zeros((B, H), jnp.float32)
    else:
        h0 = hidden.reshape(B, H).astype(jnp.float32)

    Bt = _pick_batch_block(B)
    Tc = _pick_time_chunk(T)
    grid = (B // Bt, T // Tc)

    const2d = lambda shape: pl.BlockSpec(shape, lambda b, c: (0, 0))

    hraw, h_last = pl.pallas_call(
        _gru_kernel,
        grid_spec=pltpu.PrefetchScalarGridSpec(
            num_scalar_prefetch=0,
            grid=grid,
            in_specs=[
                pl.BlockSpec((Bt, Tc, H), lambda b, c: (b, c, 0)),   # gi_r
                pl.BlockSpec((Bt, Tc, H), lambda b, c: (b, c, 0)),   # gi_z
                pl.BlockSpec((Bt, Tc, H), lambda b, c: (b, c, 0)),   # gi_n
                pl.BlockSpec((Bt, H), lambda b, c: (b, 0)),          # h0
                const2d((H, H)),                                      # w_hr_t
                const2d((H, H)),                                      # w_hz_t
                const2d((H, H)),                                      # w_hn_t
                const2d((1, H)),                                      # b_hn
            ],
            out_specs=[
                pl.BlockSpec((Bt, Tc, H), lambda b, c: (b, c, 0)),    # raw h sequence
                pl.BlockSpec((Bt, H), lambda b, c: (b, 0)),           # final hidden
            ],
            scratch_shapes=[pltpu.VMEM((Bt, H), jnp.float32)],
        ),
        out_shape=(
            jax.ShapeDtypeStruct((B, T, H), jnp.float32),
            jax.ShapeDtypeStruct((B, H), jnp.float32),
        ),
        compiler_params=pltpu.CompilerParams(
            dimension_semantics=("parallel", "arbitrary"),
            vmem_limit_bytes=VMEM_LIMIT,
        ),
    )(gi_r, gi_z, gi_n, h0,
      prepared["w_hr_t"], prepared["w_hz_t"], prepared["w_hn_t"], prepared["b_hn"])

    # skip-add + LayerNorm (parallel elementwise pass).
    out2d = add_layernorm(hraw.reshape(B * T, H), skip,
                          prepared["ln_gamma"], prepared["ln_beta"])

    # Vocab projection (weights pre-padded to a lane-dense multiple of 128).
    logits = matmul_bias(out2d.astype(jnp.bfloat16), prepared["w_fc_t"],
                         prepared["b_fc"], out_dtype=jnp.float32)
    logits = logits[:, :V].reshape(B, T, V)

    out = out2d.reshape(B, T, H)
    hidden_new = h_last[None, :, :]                        # (1, B, H)
    return logits, out, hidden_new


# ---------------------------------------------------------------------------
# Parameters: PyTorch layout, then a one-time repack into kernel-friendly layout.
# ---------------------------------------------------------------------------
def init_params(key, num_tokens, embedding_dim, hidden_size):
    """PyTorch-layout parameters (same tensors as FirstModel)."""
    V, E, H = num_tokens, embedding_dim, hidden_size
    ks = jax.random.split(key, 9)
    s = 0.1
    return {
        "embedding": s * jax.random.normal(ks[0], (V, E), jnp.float32),
        "w_ih": s * jax.random.normal(ks[1], (3 * H, E), jnp.float32),   # rows [r|z|n]
        "w_hh": s * jax.random.normal(ks[2], (3 * H, H), jnp.float32),   # rows [r|z|n]
        "b_ih": s * jax.random.normal(ks[3], (3 * H,), jnp.float32),
        "b_hh": s * jax.random.normal(ks[4], (3 * H,), jnp.float32),
        "w_skip": s * jax.random.normal(ks[5], (H, E), jnp.float32),
        "b_skip": s * jax.random.normal(ks[6], (H,), jnp.float32),
        "ln_gamma": jnp.ones((H,), jnp.float32),
        "ln_beta": jnp.zeros((H,), jnp.float32),
        "w_fc": s * jax.random.normal(ks[7], (V, H), jnp.float32),
        "b_fc": s * jax.random.normal(ks[8], (V,), jnp.float32),
    }


def prepare_params(p):
    """One-time repack: pre-transposed, per-gate split (lane-dense slabs), r/z hidden
    biases folded into the input-side biases, MXU weights stored bf16, vocab padded
    to a multiple of 128."""
    H = p["w_hh"].shape[1]
    V = p["w_fc"].shape[0]
    bf = jnp.bfloat16

    w_ir, w_iz, w_in = jnp.split(p["w_ih"], 3, axis=0)    # each (H, E)
    w_hr, w_hz, w_hn = jnp.split(p["w_hh"], 3, axis=0)    # each (H, H)
    b_ir, b_iz, b_in = jnp.split(p["b_ih"], 3)
    b_hr, b_hz, b_hn = jnp.split(p["b_hh"], 3)

    v_pad = ((V + 127) // 128) * 128
    w_fc_t = p["w_fc"].T.astype(bf)                       # (H, V)
    b_fc = p["b_fc"].astype(jnp.float32)
    if v_pad != V:
        w_fc_t = jnp.pad(w_fc_t, ((0, 0), (0, v_pad - V)))
        b_fc = jnp.pad(b_fc, (0, v_pad - V))

    return {
        "embedding": p["embedding"].astype(jnp.float32),
        "w_ir_t": w_ir.T.astype(bf), "w_iz_t": w_iz.T.astype(bf), "w_in_t": w_in.T.astype(bf),
        "b_r": (b_ir + b_hr).astype(jnp.float32),         # b_ir + b_hr folded
        "b_z": (b_iz + b_hz).astype(jnp.float32),         # b_iz + b_hz folded
        "b_in": b_in.astype(jnp.float32),
        "w_hr_t": w_hr.T.astype(bf), "w_hz_t": w_hz.T.astype(bf), "w_hn_t": w_hn.T.astype(bf),
        "b_hn": b_hn.reshape(1, H).astype(jnp.float32),
        "w_skip_t": p["w_skip"].T.astype(bf),
        "b_skip": p["b_skip"].astype(jnp.float32),
        "ln_gamma": p["ln_gamma"].astype(jnp.float32),
        "ln_beta": p["ln_beta"].astype(jnp.float32),
        "w_fc_t": w_fc_t,
        "b_fc": b_fc,
    }


if __name__ == "__main__":
    num_tokens, embedding_dim, hidden_size = 16, 32, 32
    B, T = 2, 8

    key = jax.random.PRNGKey(0)
    pkey, tkey = jax.random.split(key)
    params = init_params(pkey, num_tokens, embedding_dim, hidden_size)
    prepared = prepare_params(params)
    tokens = jax.random.randint(tkey, (B, T), 0, num_tokens, dtype=jnp.int32)

    logits, out, hidden_new = first_model_forward(tokens, prepared)
    jax.block_until_ready((logits, out, hidden_new))

    assert logits.shape == (B, T, num_tokens)
    assert out.shape == (B, T, hidden_size)
    assert hidden_new.shape == (1, B, hidden_size)
    assert bool(jnp.all(jnp.isfinite(logits)))
    assert bool(jnp.all(jnp.isfinite(out)))
    print("KERNEL_OK")
</pallas_src>

<mosaic_0001>
module attributes {stable_mosaic.version = 11 : i64} {
  func.func @_matmul_bias_kernel(%arg0: i32, %arg1: i32, %arg2: i32, %arg3: memref<16x32xbf16, #tpu.memory_space<vmem>>, %arg4: memref<32x32xbf16, #tpu.memory_space<vmem>>, %arg5: memref<1x32xf32, #tpu.memory_space<vmem>>, %arg6: memref<16x32xbf16, #tpu.memory_space<vmem>>, %arg7: memref<16x32xf32, #tpu.memory_space<vmem>>) attributes {dimension_semantics = [#tpu.dimension_semantics<parallel>, #tpu.dimension_semantics<parallel>, #tpu.dimension_semantics<arbitrary>], iteration_bounds = array<i64: 1, 1, 1>, scalar_prefetch = 0 : i64, scratch_operands = 1 : i64, tpu.core_type = #tpu.core_type<tc>, window_params = [{transform_indices = @transform_0, window_bounds = array<i64: 16, 32>}, {transform_indices = @transform_1, window_bounds = array<i64: 32, 32>}, {transform_indices = @transform_2, window_bounds = array<i64: 1, 32>}, {transform_indices = @transform_3, window_bounds = array<i64: 16, 32>}]} {
    %c0_i32 = arith.constant 0 : i32
    %0 = arith.cmpi eq, %arg2, %c0_i32 : i32
    %1 = arith.extui %0 : i1 to i32
    %c0_i32_0 = arith.constant 0 : i32
    %2 = arith.cmpi ne, %1, %c0_i32_0 : i32
    scf.if %2 {
      %cst_10 = arith.constant 0.000000e+00 : f32
      %12 = vector.broadcast %cst_10 : f32 to vector<16x32xf32>
      %c0_11 = arith.constant 0 : index
      %c0_12 = arith.constant 0 : index
      %13 = vector.load %arg7[%c0_11, %c0_12] : memref<16x32xf32, #tpu.memory_space<vmem>>, vector<16x32xf32>
      tpu.vector_store %arg7[%c0_11, %c0_12], %12 {strides = array<i32>} : memref<16x32xf32, #tpu.memory_space<vmem>>, vector<16x32xf32>,
    } else {
    }
    %c0 = arith.constant 0 : index
    %c0_1 = arith.constant 0 : index
    %3 = vector.load %arg7[%c0, %c0_1] : memref<16x32xf32, #tpu.memory_space<vmem>>, vector<16x32xf32>
    %c0_2 = arith.constant 0 : index
    %c0_3 = arith.constant 0 : index
    %4 = vector.load %arg3[%c0_2, %c0_3] : memref<16x32xbf16, #tpu.memory_space<vmem>>, vector<16x32xbf16>
    %c0_4 = arith.constant 0 : index
    %c0_5 = arith.constant 0 : index
    %5 = vector.load %arg4[%c0_4, %c0_5] : memref<32x32xbf16, #tpu.memory_space<vmem>>, vector<32x32xbf16>
    %cst = arith.constant dense<0.000000e+00> : vector<16x32xf32>
    %6 = tpu.matmul %4, %5, %cst {dimension_numbers = #tpu.dot_dimension_numbers<[1], [0], [0], [1], [0, 0, 1, 1], [], []>} : vector<16x32xbf16>, vector<32x32xbf16>, vector<16x32xf32> -> vector<16x32xf32>
    %7 = arith.addf %3, %6 : vector<16x32xf32>
    %c0_6 = arith.constant 0 : index
    %c0_7 = arith.constant 0 : index
    %8 = vector.load %arg7[%c0_6, %c0_7] : memref<16x32xf32, #tpu.memory_space<vmem>>, vector<16x32xf32>
    tpu.vector_store %arg7[%c0_6, %c0_7], %7 {strides = array<i32>} : memref<16x32xf32, #tpu.memory_space<vmem>>, vector<16x32xf32>,
    %c0_i32_8 = arith.constant 0 : i32
    %9 = arith.cmpi eq, %arg2, %c0_i32_8 : i32
    %10 = arith.extui %9 : i1 to i32
    %c0_i32_9 = arith.constant 0 : i32
    %11 = arith.cmpi ne, %10, %c0_i32_9 : i32
    scf.if %11 {
      %c0_10 = arith.constant 0 : index
      %c0_11 = arith.constant 0 : index
      %12 = vector.load %arg7[%c0_10, %c0_11] : memref<16x32xf32, #tpu.memory_space<vmem>>, vector<16x32xf32>
      %c0_12 = arith.constant 0 : index
      %c0_13 = arith.constant 0 : index
      %13 = vector.load %arg5[%c0_12, %c0_13] : memref<1x32xf32, #tpu.memory_space<vmem>>, vector<1x32xf32>
      %14 = vector.broadcast %13 : vector<1x32xf32> to vector<16x32xf32>
      %15 = arith.addf %12, %14 : vector<16x32xf32>
      %16 = arith.truncf %15 : vector<16x32xf32> to vector<16x32xbf16>
      %c0_14 = arith.constant 0 : index
      %c0_15 = arith.constant 0 : index
      %17 = vector.load %arg6[%c0_14, %c0_15] : memref<16x32xbf16, #tpu.memory_space<vmem>>, vector<16x32xbf16>
      tpu.vector_store %arg6[%c0_14, %c0_15], %16 {strides = array<i32>} : memref<16x32xbf16, #tpu.memory_space<vmem>>, vector<16x32xbf16>,
    } else {
    }
    return
  }
  func.func @transform_0(%arg0: i32, %arg1: i32, %arg2: i32) -> (i32, i32) {
    %c0_i32 = arith.constant 0 : i32
    return %arg0, %arg2 : i32, i32
  }
  func.func @transform_1(%arg0: i32, %arg1: i32, %arg2: i32) -> (i32, i32) {
    %c0_i32 = arith.constant 0 : i32
    return %arg2, %arg1 : i32, i32
  }
  func.func @transform_2(%arg0: i32, %arg1: i32, %arg2: i32) -> (i32, i32) {
    %c0_i32 = arith.constant 0 : i32
    %c0_i32_0 = arith.constant 0 : i32
    return %c0_i32, %arg1 : i32, i32
  }
  func.func @transform_3(%arg0: i32, %arg1: i32, %arg2: i32) -> (i32, i32) {
    %c0_i32 = arith.constant 0 : i32
    return %arg0, %arg1 : i32, i32
  }
}

module attributes {stable_mosaic.version = 11 : i64} {
  func.func @_matmul_bias_kernel(%arg0: i32, %arg1: i32, %arg2: i32, %arg3: memref<16x32xbf16, #tpu.memory_space<vmem>>, %arg4: memref<32x32xbf16, #tpu.memory_space<vmem>>, %arg5: memref<1x32xf32, #tpu.memory_space<vmem>>, %arg6: memref<16x32xf32, #tpu.memory_space<vmem>>, %arg7: memref<16x32xf32, #tpu.memory_space<vmem>>) attributes {dimension_semantics = [#tpu.dimension_semantics<parallel>, #tpu.dimension_semantics<parallel>, #tpu.dimension_semantics<arbitrary>], iteration_bounds = array<i64: 1, 1, 1>, scalar_prefetch = 0 : i64, scratch_operands = 1 : i64, tpu.core_type = #tpu.core_type<tc>, window_params = [{transform_indices = @transform_0, window_bounds = array<i64: 16, 32>}, {transform_indices = @transform_1, window_bounds = array<i64: 32, 32>}, {transform_indices = @transform_2, window_bounds = array<i64: 1, 32>}, {transform_indices = @transform_3, window_bounds = array<i64: 16, 32>}]} {
    %c0_i32 = arith.constant 0 : i32
    %0 = arith.cmpi eq, %arg2, %c0_i32 : i32
    %1 = arith.extui %0 : i1 to i32
    %c0_i32_0 = arith.constant 0 : i32
    %2 = arith.cmpi ne, %1, %c0_i32_0 : i32
    scf.if %2 {
      %cst_10 = arith.constant 0.000000e+00 : f32
      %12 = vector.broadcast %cst_10 : f32 to vector<16x32xf32>
      %c0_11 = arith.constant 0 : index
      %c0_12 = arith.constant 0 : index
      %13 = vector.load %arg7[%c0_11, %c0_12] : memref<16x32xf32, #tpu.memory_space<vmem>>, vector<16x32xf32>
      tpu.vector_store %arg7[%c0_11, %c0_12], %12 {strides = array<i32>} : memref<16x32xf32, #tpu.memory_space<vmem>>, vector<16x32xf32>,
    } else {
    }
    %c0 = arith.constant 0 : index
    %c0_1 = arith.constant 0 : index
    %3 = vector.load %arg7[%c0, %c0_1] : memref<16x32xf32, #tpu.memory_space<vmem>>, vector<16x32xf32>
    %c0_2 = arith.constant 0 : index
    %c0_3 = arith.constant 0 : index
    %4 = vector.load %arg3[%c0_2, %c0_3] : memref<16x32xbf16, #tpu.memory_space<vmem>>, vector<16x32xbf16>
    %c0_4 = arith.constant 0 : index
    %c0_5 = arith.constant 0 : index
    %5 = vector.load %arg4[%c0_4, %c0_5] : memref<32x32xbf16, #tpu.memory_space<vmem>>, vector<32x32xbf16>
    %cst = arith.constant dense<0.000000e+00> : vector<16x32xf32>
    %6 = tpu.matmul %4, %5, %cst {dimension_numbers = #tpu.dot_dimension_numbers<[1], [0], [0], [1], [0, 0, 1, 1], [], []>} : vector<16x32xbf16>, vector<32x32xbf16>, vector<16x32xf32> -> vector<16x32xf32>
    %7 = arith.addf %3, %6 : vector<16x32xf32>
    %c0_6 = arith.constant 0 : index
    %c0_7 = arith.constant 0 : index
    %8 = vector.load %arg7[%c0_6, %c0_7] : memref<16x32xf32, #tpu.memory_space<vmem>>, vector<16x32xf32>
    tpu.vector_store %arg7[%c0_6, %c0_7], %7 {strides = array<i32>} : memref<16x32xf32, #tpu.memory_space<vmem>>, vector<16x32xf32>,
    %c0_i32_8 = arith.constant 0 : i32
    %9 = arith.cmpi eq, %arg2, %c0_i32_8 : i32
    %10 = arith.extui %9 : i1 to i32
    %c0_i32_9 = arith.constant 0 : i32
    %11 = arith.cmpi ne, %10, %c0_i32_9 : i32
    scf.if %11 {
      %c0_10 = arith.constant 0 : index
      %c0_11 = arith.constant 0 : index
      %12 = vector.load %arg7[%c0_10, %c0_11] : memref<16x32xf32, #tpu.memory_space<vmem>>, vector<16x32xf32>
      %c0_12 = arith.constant 0 : index
      %c0_13 = arith.constant 0 : index
      %13 = vector.load %arg5[%c0_12, %c0_13] : memref<1x32xf32, #tpu.memory_space<vmem>>, vector<1x32xf32>
      %14 = vector.broadcast %13 : vector<1x32xf32> to vector<16x32xf32>
      %15 = arith.addf %12, %14 : vector<16x32xf32>
      %c0_14 = arith.constant 0 : index
      %c0_15 = arith.constant 0 : index
      %16 = vector.load %arg6[%c0_14, %c0_15] : memref<16x32xf32, #tpu.memory_space<vmem>>, vector<16x32xf32>
      tpu.vector_store %arg6[%c0_14, %c0_15], %15 {strides = array<i32>} : memref<16x32xf32, #tpu.memory_space<vmem>>, vector<16x32xf32>,
    } else {
    }
    return
  }
  func.func @transform_0(%arg0: i32, %arg1: i32, %arg2: i32) -> (i32, i32) {
    %c0_i32 = arith.constant 0 : i32
    return %arg0, %arg2 : i32, i32
  }
  func.func @transform_1(%arg0: i32, %arg1: i32, %arg2: i32) -> (i32, i32) {
    %c0_i32 = arith.constant 0 : i32
    return %arg2, %arg1 : i32, i32
  }
  func.func @transform_2(%arg0: i32, %arg1: i32, %arg2: i32) -> (i32, i32) {
    %c0_i32 = arith.constant 0 : i32
    %c0_i32_0 = arith.constant 0 : i32
    return %c0_i32, %arg1 : i32, i32
  }
  func.func @transform_3(%arg0: i32, %arg1: i32, %arg2: i32) -> (i32, i32) {
    %c0_i32 = arith.constant 0 : i32
    return %arg0, %arg1 : i32, i32
  }
}

module attributes {stable_mosaic.version = 11 : i64} {
  func.func @_add_ln_kernel(%arg0: i32, %arg1: memref<16x32xf32, #tpu.memory_space<vmem>>, %arg2: memref<16x32xbf16, #tpu.memory_space<vmem>>, %arg3: memref<1x32xf32, #tpu.memory_space<vmem>>, %arg4: memref<1x32xf32, #tpu.memory_space<vmem>>, %arg5: memref<16x32xf32, #tpu.memory_space<vmem>>) attributes {dimension_semantics = [#tpu.dimension_semantics<parallel>], iteration_bounds = array<i64: 1>, scalar_prefetch = 0 : i64, scratch_operands = 0 : i64, tpu.core_type = #tpu.core_type<tc>, window_params = [{transform_indices = @transform_0, window_bounds = array<i64: 16, 32>}, {transform_indices = @transform_1, window_bounds = array<i64: 16, 32>}, {pipeline_mode = #tpu.pipeline_mode<synchronous>, transform_indices = @transform_2, window_bounds = array<i64: 1, 32>}, {pipeline_mode = #tpu.pipeline_mode<synchronous>, transform_indices = @transform_3, window_bounds = array<i64: 1, 32>}, {transform_indices = @transform_4, window_bounds = array<i64: 16, 32>}]} {
    %c0 = arith.constant 0 : index
    %c0_0 = arith.constant 0 : index
    %0 = vector.load %arg1[%c0, %c0_0] : memref<16x32xf32, #tpu.memory_space<vmem>>, vector<16x32xf32>
    %c0_1 = arith.constant 0 : index
    %c0_2 = arith.constant 0 : index
    %1 = vector.load %arg2[%c0_1, %c0_2] : memref<16x32xbf16, #tpu.memory_space<vmem>>, vector<16x32xbf16>
    %2 = arith.extf %1 : vector<16x32xbf16> to vector<16x32xf32>
    %3 = arith.addf %0, %2 : vector<16x32xf32>
    %cst = arith.constant dense<0.000000e+00> : vector<16xf32>
    %4 = vector.multi_reduction <add>, %3, %cst [1] : vector<16x32xf32> to vector<16xf32>
    %5 = vector.shape_cast %4 : vector<16xf32> to vector<16x1xf32>
    %cst_3 = arith.constant 3.200000e+01 : f32
    %6 = vector.broadcast %cst_3 : f32 to vector<16x1xf32>
    %7 = arith.divf %5, %6 : vector<16x1xf32>
    %8 = vector.broadcast %7 : vector<16x1xf32> to vector<16x32xf32>
    %9 = arith.subf %3, %8 : vector<16x32xf32>
    %10 = arith.mulf %9, %9 : vector<16x32xf32>
    %cst_4 = arith.constant dense<0.000000e+00> : vector<16xf32>
    %11 = vector.multi_reduction <add>, %10, %cst_4 [1] : vector<16x32xf32> to vector<16xf32>
    %12 = vector.shape_cast %11 : vector<16xf32> to vector<16x1xf32>
    %cst_5 = arith.constant 3.200000e+01 : f32
    %13 = vector.broadcast %cst_5 : f32 to vector<16x1xf32>
    %14 = arith.divf %12, %13 : vector<16x1xf32>
    %15 = vector.broadcast %7 : vector<16x1xf32> to vector<16x32xf32>
    %16 = arith.subf %3, %15 : vector<16x32xf32>
    %cst_6 = arith.constant 9.99999974E-6 : f32
    %17 = vector.broadcast %cst_6 : f32 to vector<16x1xf32>
    %18 = arith.addf %14, %17 : vector<16x1xf32>
    %19 = math.rsqrt %18 : vector<16x1xf32>
    %20 = vector.broadcast %19 : vector<16x1xf32> to vector<16x32xf32>
    %21 = arith.mulf %16, %20 : vector<16x32xf32>
    %c0_7 = arith.constant 0 : index
    %c0_8 = arith.constant 0 : index
    %22 = vector.load %arg3[%c0_7, %c0_8] : memref<1x32xf32, #tpu.memory_space<vmem>>, vector<1x32xf32>
    %23 = vector.broadcast %22 : vector<1x32xf32> to vector<16x32xf32>
    %24 = arith.mulf %21, %23 : vector<16x32xf32>
    %c0_9 = arith.constant 0 : index
    %c0_10 = arith.constant 0 : index
    %25 = vector.load %arg4[%c0_9, %c0_10] : memref<1x32xf32, #tpu.memory_space<vmem>>, vector<1x32xf32>
    %26 = vector.broadcast %25 : vector<1x32xf32> to vector<16x32xf32>
    %27 = arith.addf %24, %26 : vector<16x32xf32>
    %c0_11 = arith.constant 0 : index
    %c0_12 = arith.constant 0 : index
    %28 = vector.load %arg5[%c0_11, %c0_12] : memref<16x32xf32, #tpu.memory_space<vmem>>, vector<16x32xf32>
    tpu.vector_store %arg5[%c0_11, %c0_12], %27 {strides = array<i32>} : memref<16x32xf32, #tpu.memory_space<vmem>>, vector<16x32xf32>,
    return
  }
  func.func @transform_0(%arg0: i32) -> (i32, i32) {
    %c0_i32 = arith.constant 0 : i32
    %c0_i32_0 = arith.constant 0 : i32
    return %arg0, %c0_i32 : i32, i32
  }
  func.func @transform_1(%arg0: i32) -> (i32, i32) {
    %c0_i32 = arith.constant 0 : i32
    %c0_i32_0 = arith.constant 0 : i32
    return %arg0, %c0_i32 : i32, i32
  }
  func.func @transform_2(%arg0: i32) -> (i32, i32) {
    %c0_i32 = arith.constant 0 : i32
    %c0_i32_0 = arith.constant 0 : i32
    %c0_i32_1 = arith.constant 0 : i32
    return %c0_i32, %c0_i32_0 : i32, i32
  }
  func.func @transform_3(%arg0: i32) -> (i32, i32) {
    %c0_i32 = arith.constant 0 : i32
    %c0_i32_0 = arith.constant 0 : i32
    %c0_i32_1 = arith.constant 0 : i32
    return %c0_i32, %c0_i32_0 : i32, i32
  }
  func.func @transform_4(%arg0: i32) -> (i32, i32) {
    %c0_i32 = arith.constant 0 : i32
    %c0_i32_0 = arith.constant 0 : i32
    return %arg0, %c0_i32 : i32, i32
  }
}

module attributes {stable_mosaic.version = 11 : i64} {
  func.func @_gru_kernel(%arg0: i32, %arg1: i32, %arg2: memref<2x8x32xf32, #tpu.memory_space<vmem>>, %arg3: memref<2x8x32xf32, #tpu.memory_space<vmem>>, %arg4: memref<2x8x32xf32, #tpu.memory_space<vmem>>, %arg5: memref<2x32xf32, #tpu.memory_space<vmem>>, %arg6: memref<32x32xbf16, #tpu.memory_space<vmem>>, %arg7: memref<32x32xbf16, #tpu.memory_space<vmem>>, %arg8: memref<32x32xbf16, #tpu.memory_space<vmem>>, %arg9: memref<1x32xf32, #tpu.memory_space<vmem>>, %arg10: memref<2x8x32xf32, #tpu.memory_space<vmem>>, %arg11: memref<2x32xf32, #tpu.memory_space<vmem>>, %arg12: memref<2x32xf32, #tpu.memory_space<vmem>>) attributes {dimension_semantics = [#tpu.dimension_semantics<parallel>, #tpu.dimension_semantics<arbitrary>], iteration_bounds = array<i64: 1, 1>, scalar_prefetch = 0 : i64, scratch_operands = 1 : i64, tpu.core_type = #tpu.core_type<tc>, window_params = [{transform_indices = @transform_0, window_bounds = array<i64: 2, 8, 32>}, {transform_indices = @transform_1, window_bounds = array<i64: 2, 8, 32>}, {transform_indices = @transform_2, window_bounds = array<i64: 2, 8, 32>}, {transform_indices = @transform_3, window_bounds = array<i64: 2, 32>}, {pipeline_mode = #tpu.pipeline_mode<synchronous>, transform_indices = @transform_4, window_bounds = array<i64: 32, 32>}, {pipeline_mode = #tpu.pipeline_mode<synchronous>, transform_indices = @transform_5, window_bounds = array<i64: 32, 32>}, {pipeline_mode = #tpu.pipeline_mode<synchronous>, transform_indices = @transform_6, window_bounds = array<i64: 32, 32>}, {pipeline_mode = #tpu.pipeline_mode<synchronous>, transform_indices = @transform_7, window_bounds = array<i64: 1, 32>}, {transform_indices = @transform_8, window_bounds = array<i64: 2, 8, 32>}, {transform_indices = @transform_9, window_bounds = array<i64: 2, 32>}]} {
    %c0_i32 = arith.constant 0 : i32
    %0 = arith.cmpi eq, %arg1, %c0_i32 : i32
    %1 = arith.extui %0 : i1 to i32
    %c0_i32_0 = arith.constant 0 : i32
    %2 = arith.cmpi ne, %1, %c0_i32_0 : i32
    scf.if %2 {
      %c0_142 = arith.constant 0 : index
      %c0_143 = arith.constant 0 : index
      %276 = vector.load %arg5[%c0_142, %c0_143] : memref<2x32xf32, #tpu.memory_space<vmem>>, vector<2x32xf32>
      %c0_144 = arith.constant 0 : index
      %c0_145 = arith.constant 0 : index
      %277 = vector.load %arg12[%c0_144, %c0_145] : memref<2x32xf32, #tpu.memory_space<vmem>>, vector<2x32xf32>
      tpu.vector_store %arg12[%c0_144, %c0_145], %276 {strides = array<i32>} : memref<2x32xf32, #tpu.memory_space<vmem>>, vector<2x32xf32>,
    } else {
    }
    %c0 = arith.constant 0 : index
    %c0_1 = arith.constant 0 : index
    %3 = vector.load %arg6[%c0, %c0_1] : memref<32x32xbf16, #tpu.memory_space<vmem>>, vector<32x32xbf16>
    %c0_2 = arith.constant 0 : index
    %c0_3 = arith.constant 0 : index
    %4 = vector.load %arg7[%c0_2, %c0_3] : memref<32x32xbf16, #tpu.memory_space<vmem>>, vector<32x32xbf16>
    %c0_4 = arith.constant 0 : index
    %c0_5 = arith.constant 0 : index
    %5 = vector.load %arg8[%c0_4, %c0_5] : memref<32x32xbf16, #tpu.memory_space<vmem>>, vector<32x32xbf16>
    %c0_6 = arith.constant 0 : index
    %c0_7 = arith.constant 0 : index
    %6 = vector.load %arg9[%c0_6, %c0_7] : memref<1x32xf32, #tpu.memory_space<vmem>>, vector<1x32xf32>
    %c0_8 = arith.constant 0 : index
    %c0_9 = arith.constant 0 : index
    %7 = vector.load %arg12[%c0_8, %c0_9] : memref<2x32xf32, #tpu.memory_space<vmem>>, vector<2x32xf32>
    %8 = arith.truncf %7 : vector<2x32xf32> to vector<2x32xbf16>
    %cst = arith.constant dense<0.000000e+00> : vector<2x32xf32>
    %9 = tpu.matmul %8, %3, %cst {dimension_numbers = #tpu.dot_dimension_numbers<[1], [0], [0], [1], [0, 0, 1, 1], [], []>} : vector<2x32xbf16>, vector<32x32xbf16>, vector<2x32xf32> -> vector<2x32xf32>
    %cst_10 = arith.constant dense<0.000000e+00> : vector<2x32xf32>
    %10 = tpu.matmul %8, %4, %cst_10 {dimension_numbers = #tpu.dot_dimension_numbers<[1], [0], [0], [1], [0, 0, 1, 1], [], []>} : vector<2x32xbf16>, vector<32x32xbf16>, vector<2x32xf32> -> vector<2x32xf32>
    %cst_11 = arith.constant dense<0.000000e+00> : vector<2x32xf32>
    %11 = tpu.matmul %8, %5, %cst_11 {dimension_numbers = #tpu.dot_dimension_numbers<[1], [0], [0], [1], [0, 0, 1, 1], [], []>} : vector<2x32xbf16>, vector<32x32xbf16>, vector<2x32xf32> -> vector<2x32xf32>
    %12 = vector.broadcast %6 : vector<1x32xf32> to vector<2x32xf32>
    %13 = arith.addf %11, %12 : vector<2x32xf32>
    %c0_12 = arith.constant 0 : index
    %c0_13 = arith.constant 0 : index
    %c0_14 = arith.constant 0 : index
    %14 = vector.load %arg2[%c0_12, %c0_13, %c0_14] : memref<2x8x32xf32, #tpu.memory_space<vmem>>, vector<2x1x32xf32>
    %15 = vector.shape_cast %14 : vector<2x1x32xf32> to vector<2x32xf32>
    %16 = arith.addf %15, %9 : vector<2x32xf32>
    %17 = arith.negf %16 : vector<2x32xf32>
    %18 = math.exp %17 : vector<2x32xf32>
    %cst_15 = arith.constant 1.000000e+00 : f32
    %19 = vector.broadcast %cst_15 : f32 to vector<2x32xf32>
    %20 = arith.addf %19, %18 : vector<2x32xf32>
    %21 = arith.divf %19, %20 : vector<2x32xf32>
    %c0_16 = arith.constant 0 : index
    %c0_17 = arith.constant 0 : index
    %c0_18 = arith.constant 0 : index
    %22 = vector.load %arg3[%c0_16, %c0_17, %c0_18] : memref<2x8x32xf32, #tpu.memory_space<vmem>>, vector<2x1x32xf32>
    %23 = vector.shape_cast %22 : vector<2x1x32xf32> to vector<2x32xf32>
    %24 = arith.addf %23, %10 : vector<2x32xf32>
    %25 = arith.negf %24 : vector<2x32xf32>
    %26 = math.exp %25 : vector<2x32xf32>
    %cst_19 = arith.constant 1.000000e+00 : f32
    %27 = vector.broadcast %cst_19 : f32 to vector<2x32xf32>
    %28 = arith.addf %27, %26 : vector<2x32xf32>
    %29 = arith.divf %27, %28 : vector<2x32xf32>
    %c0_20 = arith.constant 0 : index
    %c0_21 = arith.constant 0 : index
    %c0_22 = arith.constant 0 : index
    %30 = vector.load %arg4[%c0_20, %c0_21, %c0_22] : memref<2x8x32xf32, #tpu.memory_space<vmem>>, vector<2x1x32xf32>
    %31 = vector.shape_cast %30 : vector<2x1x32xf32> to vector<2x32xf32>
    %32 = arith.mulf %21, %13 : vector<2x32xf32>
    %33 = arith.addf %31, %32 : vector<2x32xf32>
    %34 = math.tanh %33 : vector<2x32xf32>
    %35 = arith.subf %7, %34 : vector<2x32xf32>
    %36 = arith.mulf %29, %35 : vector<2x32xf32>
    %37 = arith.addf %34, %36 : vector<2x32xf32>
    %c0_23 = arith.constant 0 : index
    %c0_24 = arith.constant 0 : index
    %c0_25 = arith.constant 0 : index
    %38 = vector.load %arg10[%c0_23, %c0_24, %c0_25] : memref<2x8x32xf32, #tpu.memory_space<vmem>>, vector<2x1x32xf32>
    %39 = vector.shape_cast %38 : vector<2x1x32xf32> to vector<2x32xf32>
    %40 = vector.shape_cast %37 : vector<2x32xf32> to vector<2x1x32xf32>
    tpu.vector_store %arg10[%c0_23, %c0_24, %c0_25], %40 {strides = array<i32>} : memref<2x8x32xf32, #tpu.memory_space<vmem>>, vector<2x1x32xf32>,
    %41 = arith.truncf %37 : vector<2x32xf32> to vector<2x32xbf16>
    %cst_26 = arith.constant dense<0.000000e+00> : vector<2x32xf32>
    %42 = tpu.matmul %41, %3, %cst_26 {dimension_numbers = #tpu.dot_dimension_numbers<[1], [0], [0], [1], [0, 0, 1, 1], [], []>} : vector<2x32xbf16>, vector<32x32xbf16>, vector<2x32xf32> -> vector<2x32xf32>
    %cst_27 = arith.constant dense<0.000000e+00> : vector<2x32xf32>
    %43 = tpu.matmul %41, %4, %cst_27 {dimension_numbers = #tpu.dot_dimension_numbers<[1], [0], [0], [1], [0, 0, 1, 1], [], []>} : vector<2x32xbf16>, vector<32x32xbf16>, vector<2x32xf32> -> vector<2x32xf32>
    %cst_28 = arith.constant dense<0.000000e+00> : vector<2x32xf32>
    %44 = tpu.matmul %41, %5, %cst_28 {dimension_numbers = #tpu.dot_dimension_numbers<[1], [0], [0], [1], [0, 0, 1, 1], [], []>} : vector<2x32xbf16>, vector<32x32xbf16>, vector<2x32xf32> -> vector<2x32xf32>
    %45 = vector.broadcast %6 : vector<1x32xf32> to vector<2x32xf32>
    %46 = arith.addf %44, %45 : vector<2x32xf32>
    %c0_29 = arith.constant 0 : index
    %c1 = arith.constant 1 : index
    %c0_30 = arith.constant 0 : index
    %47 = vector.load %arg2[%c0_29, %c1, %c0_30] : memref<2x8x32xf32, #tpu.memory_space<vmem>>, vector<2x1x32xf32>
    %48 = vector.shape_cast %47 : vector<2x1x32xf32> to vector<2x32xf32>
    %49 = arith.addf %48, %42 : vector<2x32xf32>
    %50 = arith.negf %49 : vector<2x32xf32>
    %51 = math.exp %50 : vector<2x32xf32>
    %cst_31 = arith.constant 1.000000e+00 : f32
    %52 = vector.broadcast %cst_31 : f32 to vector<2x32xf32>
    %53 = arith.addf %52, %51 : vector<2x32xf32>
    %54 = arith.divf %52, %53 : vector<2x32xf32>
    %c0_32 = arith.constant 0 : index
    %c1_33 = arith.constant 1 : index
    %c0_34 = arith.constant 0 : index
    %55 = vector.load %arg3[%c0_32, %c1_33, %c0_34] : memref<2x8x32xf32, #tpu.memory_space<vmem>>, vector<2x1x32xf32>
    %56 = vector.shape_cast %55 : vector<2x1x32xf32> to vector<2x32xf32>
    %57 = arith.addf %56, %43 : vector<2x32xf32>
    %58 = arith.negf %57 : vector<2x32xf32>
    %59 = math.exp %58 : vector<2x32xf32>
    %cst_35 = arith.constant 1.000000e+00 : f32
    %60 = vector.broadcast %cst_35 : f32 to vector<2x32xf32>
    %61 = arith.addf %60, %59 : vector<2x32xf32>
    %62 = arith.divf %60, %61 : vector<2x32xf32>
    %c0_36 = arith.constant 0 : index
    %c1_37 = arith.constant 1 : index
    %c0_38 = arith.constant 0 : index
    %63 = vector.load %arg4[%c0_36, %c1_37, %c0_38] : memref<2x8x32xf32, #tpu.memory_space<vmem>>, vector<2x1x32xf32>
    %64 = vector.shape_cast %63 : vector<2x1x32xf32> to vector<2x32xf32>
    %65 = arith.mulf %54, %46 : vector<2x32xf32>
    %66 = arith.addf %64, %65 : vector<2x32xf32>
    %67 = math.tanh %66 : vector<2x32xf32>
    %68 = arith.subf %37, %67 : vector<2x32xf32>
    %69 = arith.mulf %62, %68 : vector<2x32xf32>
    %70 = arith.addf %67, %69 : vector<2x32xf32>
    %c0_39 = arith.constant 0 : index
    %c1_40 = arith.constant 1 : index
    %c0_41 = arith.constant 0 : index
    %71 = vector.load %arg10[%c0_39, %c1_40, %c0_41] : memref<2x8x32xf32, #tpu.memory_space<vmem>>, vector<2x1x32xf32>
    %72 = vector.shape_cast %71 : vector<2x1x32xf32> to vector<2x32xf32>
    %73 = vector.shape_cast %70 : vector<2x32xf32> to vector<2x1x32xf32>
    tpu.vector_store %arg10[%c0_39, %c1_40, %c0_41], %73 {strides = array<i32>} : memref<2x8x32xf32, #tpu.memory_space<vmem>>, vector<2x1x32xf32>,
    %74 = arith.truncf %70 : vector<2x32xf32> to vector<2x32xbf16>
    %cst_42 = arith.constant dense<0.000000e+00> : vector<2x32xf32>
    %75 = tpu.matmul %74, %3, %cst_42 {dimension_numbers = #tpu.dot_dimension_numbers<[1], [0], [0], [1], [0, 0, 1, 1], [], []>} : vector<2x32xbf16>, vector<32x32xbf16>, vector<2x32xf32> -> vector<2x32xf32>
    %cst_43 = arith.constant dense<0.000000e+00> : vector<2x32xf32>
    %76 = tpu.matmul %74, %4, %cst_43 {dimension_numbers = #tpu.dot_dimension_numbers<[1], [0], [0], [1], [0, 0, 1, 1], [], []>} : vector<2x32xbf16>, vector<32x32xbf16>, vector<2x32xf32> -> vector<2x32xf32>
    %cst_44 = arith.constant dense<0.000000e+00> : vector<2x32xf32>
    %77 = tpu.matmul %74, %5, %cst_44 {dimension_numbers = #tpu.dot_dimension_numbers<[1], [0], [0], [1], [0, 0, 1, 1], [], []>} : vector<2x32xbf16>, vector<32x32xbf16>, vector<2x32xf32> -> vector<2x32xf32>
    %78 = vector.broadcast %6 : vector<1x32xf32> to vector<2x32xf32>
    %79 = arith.addf %77, %78 : vector<2x32xf32>
    %c0_45 = arith.constant 0 : index
    %c2 = arith.constant 2 : index
    %c0_46 = arith.constant 0 : index
    %80 = vector.load %arg2[%c0_45, %c2, %c0_46] : memref<2x8x32xf32, #tpu.memory_space<vmem>>, vector<2x1x32xf32>
    %81 = vector.shape_cast %80 : vector<2x1x32xf32> to vector<2x32xf32>
    %82 = arith.addf %81, %75 : vector<2x32xf32>
    %83 = arith.negf %82 : vector<2x32xf32>
    %84 = math.exp %83 : vector<2x32xf32>
    %cst_47 = arith.constant 1.000000e+00 : f32
    %85 = vector.broadcast %cst_47 : f32 to vector<2x32xf32>
    %86 = arith.addf %85, %84 : vector<2x32xf32>
    %87 = arith.divf %85, %86 : vector<2x32xf32>
    %c0_48 = arith.constant 0 : index
    %c2_49 = arith.constant 2 : index
    %c0_50 = arith.constant 0 : index
    %88 = vector.load %arg3[%c0_48, %c2_49, %c0_50] : memref<2x8x32xf32, #tpu.memory_space<vmem>>, vector<2x1x32xf32>
    %89 = vector.shape_cast %88 : vector<2x1x32xf32> to vector<2x32xf32>
    %90 = arith.addf %89, %76 : vector<2x32xf32>
    %91 = arith.negf %90 : vector<2x32xf32>
    %92 = math.exp %91 : vector<2x32xf32>
    %cst_51 = arith.constant 1.000000e+00 : f32
    %93 = vector.broadcast %cst_51 : f32 to vector<2x32xf32>
    %94 = arith.addf %93, %92 : vector<2x32xf32>
    %95 = arith.divf %93, %94 : vector<2x32xf32>
    %c0_52 = arith.constant 0 : index
    %c2_53 = arith.constant 2 : index
    %c0_54 = arith.constant 0 : index
    %96 = vector.load %arg4[%c0_52, %c2_53, %c0_54] : memref<2x8x32xf32, #tpu.memory_space<vmem>>, vector<2x1x32xf32>
    %97 = vector.shape_cast %96 : vector<2x1x32xf32> to vector<2x32xf32>
    %98 = arith.mulf %87, %79 : vector<2x32xf32>
    %99 = arith.addf %97, %98 : vector<2x32xf32>
    %100 = math.tanh %99 : vector<2x32xf32>
    %101 = arith.subf %70, %100 : vector<2x32xf32>
    %102 = arith.mulf %95, %101 : vector<2x32xf32>
    %103 = arith.addf %100, %102 : vector<2x32xf32>
    %c0_55 = arith.constant 0 : index
    %c2_56 = arith.constant 2 : index
    %c0_57 = arith.constant 0 : index
    %104 = vector.load %arg10[%c0_55, %c2_56, %c0_57] : memref<2x8x32xf32, #tpu.memory_space<vmem>>, vector<2x1x32xf32>
    %105 = vector.shape_cast %104 : vector<2x1x32xf32> to vector<2x32xf32>
    %106 = vector.shape_cast %103 : vector<2x32xf32> to vector<2x1x32xf32>
    tpu.vector_store %arg10[%c0_55, %c2_56, %c0_57], %106 {strides = array<i32>} : memref<2x8x32xf32, #tpu.memory_space<vmem>>, vector<2x1x32xf32>,
    %107 = arith.truncf %103 : vector<2x32xf32> to vector<2x32xbf16>
    %cst_58 = arith.constant dense<0.000000e+00> : vector<2x32xf32>
    %108 = tpu.matmul %107, %3, %cst_58 {dimension_numbers = #tpu.dot_dimension_numbers<[1], [0], [0], [1], [0, 0, 1, 1], [], []>} : vector<2x32xbf16>, vector<32x32xbf16>, vector<2x32xf32> -> vector<2x32xf32>
    %cst_59 = arith.constant dense<0.000000e+00> : vector<2x32xf32>
    %109 = tpu.matmul %107, %4, %cst_59 {dimension_numbers = #tpu.dot_dimension_numbers<[1], [0], [0], [1], [0, 0, 1, 1], [], []>} : vector<2x32xbf16>, vector<32x32xbf16>, vector<2x32xf32> -> vector<2x32xf32>
    %cst_60 = arith.constant dense<0.000000e+00> : vector<2x32xf32>
    %110 = tpu.matmul %107, %5, %cst_60 {dimension_numbers = #tpu.dot_dimension_numbers<[1], [0], [0], [1], [0, 0, 1, 1], [], []>} : vector<2x32xbf16>, vector<32x32xbf16>, vector<2x32xf32> -> vector<2x32xf32>
    %111 = vector.broadcast %6 : vector<1x32xf32> to vector<2x32xf32>
    %112 = arith.addf %110, %111 : vector<2x32xf32>
    %c0_61 = arith.constant 0 : index
    %c3 = arith.constant 3 : index
    %c0_62 = arith.constant 0 : index
    %113 = vector.load %arg2[%c0_61, %c3, %c0_62] : memref<2x8x32xf32, #tpu.memory_space<vmem>>, vector<2x1x32xf32>
    %114 = vector.shape_cast %113 : vector<2x1x32xf32> to vector<2x32xf32>
    %115 = arith.addf %114, %108 : vector<2x32xf32>
    %116 = arith.negf %115 : vector<2x32xf32>
    %117 = math.exp %116 : vector<2x32xf32>
    %cst_63 = arith.constant 1.000000e+00 : f32
    %118 = vector.broadcast %cst_63 : f32 to vector<2x32xf32>
    %119 = arith.addf %118, %117 : vector<2x32xf32>
    %120 = arith.divf %118, %119 : vector<2x32xf32>
    %c0_64 = arith.constant 0 : index
    %c3_65 = arith.constant 3 : index
    %c0_66 = arith.constant 0 : index
    %121 = vector.load %arg3[%c0_64, %c3_65, %c0_66] : memref<2x8x32xf32, #tpu.memory_space<vmem>>, vector<2x1x32xf32>
    %122 = vector.shape_cast %121 : vector<2x1x32xf32> to vector<2x32xf32>
    %123 = arith.addf %122, %109 : vector<2x32xf32>
    %124 = arith.negf %123 : vector<2x32xf32>
    %125 = math.exp %124 : vector<2x32xf32>
    %cst_67 = arith.constant 1.000000e+00 : f32
    %126 = vector.broadcast %cst_67 : f32 to vector<2x32xf32>
    %127 = arith.addf %126, %125 : vector<2x32xf32>
    %128 = arith.divf %126, %127 : vector<2x32xf32>
    %c0_68 = arith.constant 0 : index
    %c3_69 = arith.constant 3 : index
    %c0_70 = arith.constant 0 : index
    %129 = vector.load %arg4[%c0_68, %c3_69, %c0_70] : memref<2x8x32xf32, #tpu.memory_space<vmem>>, vector<2x1x32xf32>
    %130 = vector.shape_cast %129 : vector<2x1x32xf32> to vector<2x32xf32>
    %131 = arith.mulf %120, %112 : vector<2x32xf32>
    %132 = arith.addf %130, %131 : vector<2x32xf32>
    %133 = math.tanh %132 : vector<2x32xf32>
    %134 = arith.subf %103, %133 : vector<2x32xf32>
    %135 = arith.mulf %128, %134 : vector<2x32xf32>
    %136 = arith.addf %133, %135 : vector<2x32xf32>
    %c0_71 = arith.constant 0 : index
    %c3_72 = arith.constant 3 : index
    %c0_73 = arith.constant 0 : index
    %137 = vector.load %arg10[%c0_71, %c3_72, %c0_73] : memref<2x8x32xf32, #tpu.memory_space<vmem>>, vector<2x1x32xf32>
    %138 = vector.shape_cast %137 : vector<2x1x32xf32> to vector<2x32xf32>
    %139 = vector.shape_cast %136 : vector<2x32xf32> to vector<2x1x32xf32>
    tpu.vector_store %arg10[%c0_71, %c3_72, %c0_73], %139 {strides = array<i32>} : memref<2x8x32xf32, #tpu.memory_space<vmem>>, vector<2x1x32xf32>,
    %140 = arith.truncf %136 : vector<2x32xf32> to vector<2x32xbf16>
    %cst_74 = arith.constant dense<0.000000e+00> : vector<2x32xf32>
    %141 = tpu.matmul %140, %3, %cst_74 {dimension_numbers = #tpu.dot_dimension_numbers<[1], [0], [0], [1], [0, 0, 1, 1], [], []>} : vector<2x32xbf16>, vector<32x32xbf16>, vector<2x32xf32> -> vector<2x32xf32>
    %cst_75 = arith.constant dense<0.000000e+00> : vector<2x32xf32>
    %142 = tpu.matmul %140, %4, %cst_75 {dimension_numbers = #tpu.dot_dimension_numbers<[1], [0], [0], [1], [0, 0, 1, 1], [], []>} : vector<2x32xbf16>, vector<32x32xbf16>, vector<2x32xf32> -> vector<2x32xf32>
    %cst_76 = arith.constant dense<0.000000e+00> : vector<2x32xf32>
    %143 = tpu.matmul %140, %5, %cst_76 {dimension_numbers = #tpu.dot_dimension_numbers<[1], [0], [0], [1], [0, 0, 1, 1], [], []>} : vector<2x32xbf16>, vector<32x32xbf16>, vector<2x32xf32> -> vector<2x32xf32>
    %144 = vector.broadcast %6 : vector<1x32xf32> to vector<2x32xf32>
    %145 = arith.addf %143, %144 : vector<2x32xf32>
    %c0_77 = arith.constant 0 : index
    %c4 = arith.constant 4 : index
    %c0_78 = arith.constant 0 : index
    %146 = vector.load %arg2[%c0_77, %c4, %c0_78] : memref<2x8x32xf32, #tpu.memory_space<vmem>>, vector<2x1x32xf32>
    %147 = vector.shape_cast %146 : vector<2x1x32xf32> to vector<2x32xf32>
    %148 = arith.addf %147, %141 : vector<2x32xf32>
    %149 = arith.negf %148 : vector<2x32xf32>
    %150 = math.exp %149 : vector<2x32xf32>
    %cst_79 = arith.constant 1.000000e+00 : f32
    %151 = vector.broadcast %cst_79 : f32 to vector<2x32xf32>
    %152 = arith.addf %151, %150 : vector<2x32xf32>
    %153 = arith.divf %151, %152 : vector<2x32xf32>
    %c0_80 = arith.constant 0 : index
    %c4_81 = arith.constant 4 : index
    %c0_82 = arith.constant 0 : index
    %154 = vector.load %arg3[%c0_80, %c4_81, %c0_82] : memref<2x8x32xf32, #tpu.memory_space<vmem>>, vector<2x1x32xf32>
    %155 = vector.shape_cast %154 : vector<2x1x32xf32> to vector<2x32xf32>
    %156 = arith.addf %155, %142 : vector<2x32xf32>
    %157 = arith.negf %156 : vector<2x32xf32>
    %158 = math.exp %157 : vector<2x32xf32>
    %cst_83 = arith.constant 1.000000e+00 : f32
    %159 = vector.broadcast %cst_83 : f32 to vector<2x32xf32>
    %160 = arith.addf %159, %158 : vector<2x32xf32>
    %161 = arith.divf %159, %160 : vector<2x32xf32>
    %c0_84 = arith.constant 0 : index
    %c4_85 = arith.constant 4 : index
    %c0_86 = arith.constant 0 : index
    %162 = vector.load %arg4[%c0_84, %c4_85, %c0_86] : memref<2x8x32xf32, #tpu.memory_space<vmem>>, vector<2x1x32xf32>
    %163 = vector.shape_cast %162 : vector<2x1x32xf32> to vector<2x32xf32>
    %164 = arith.mulf %153, %145 : vector<2x32xf32>
    %165 = arith.addf %163, %164 : vector<2x32xf32>
    %166 = math.tanh %165 : vector<2x32xf32>
    %167 = arith.subf %136, %166 : vector<2x32xf32>
    %168 = arith.mulf %161, %167 : vector<2x32xf32>
    %169 = arith.addf %166, %168 : vector<2x32xf32>
    %c0_87 = arith.constant 0 : index
    %c4_88 = arith.constant 4 : index
    %c0_89 = arith.constant 0 : index
    %170 = vector.load %arg10[%c0_87, %c4_88, %c0_89] : memref<2x8x32xf32, #tpu.memory_space<vmem>>, vector<2x1x32xf32>
    %171 = vector.shape_cast %170 : vector<2x1x32xf32> to vector<2x32xf32>
    %172 = vector.shape_cast %169 : vector<2x32xf32> to vector<2x1x32xf32>
    tpu.vector_store %arg10[%c0_87, %c4_88, %c0_89], %172 {strides = array<i32>} : memref<2x8x32xf32, #tpu.memory_space<vmem>>, vector<2x1x32xf32>,
    %173 = arith.truncf %169 : vector<2x32xf32> to vector<2x32xbf16>
    %cst_90 = arith.constant dense<0.000000e+00> : vector<2x32xf32>
    %174 = tpu.matmul %173, %3, %cst_90 {dimension_numbers = #tpu.dot_dimension_numbers<[1], [0], [0], [1], [0, 0, 1, 1], [], []>} : vector<2x32xbf16>, vector<32x32xbf16>, vector<2x32xf32> -> vector<2x32xf32>
    %cst_91 = arith.constant dense<0.000000e+00> : vector<2x32xf32>
    %175 = tpu.matmul %173, %4, %cst_91 {dimension_numbers = #tpu.dot_dimension_numbers<[1], [0], [0], [1], [0, 0, 1, 1], [], []>} : vector<2x32xbf16>, vector<32x32xbf16>, vector<2x32xf32> -> vector<2x32xf32>
    %cst_92 = arith.constant dense<0.000000e+00> : vector<2x32xf32>
    %176 = tpu.matmul %173, %5, %cst_92 {dimension_numbers = #tpu.dot_dimension_numbers<[1], [0], [0], [1], [0, 0, 1, 1], [], []>} : vector<2x32xbf16>, vector<32x32xbf16>, vector<2x32xf32> -> vector<2x32xf32>
    %177 = vector.broadcast %6 : vector<1x32xf32> to vector<2x32xf32>
    %178 = arith.addf %176, %177 : vector<2x32xf32>
    %c0_93 = arith.constant 0 : index
    %c5 = arith.constant 5 : index
    %c0_94 = arith.constant 0 : index
    %179 = vector.load %arg2[%c0_93, %c5, %c0_94] : memref<2x8x32xf32, #tpu.memory_space<vmem>>, vector<2x1x32xf32>
    %180 = vector.shape_cast %179 : vector<2x1x32xf32> to vector<2x32xf32>
    %181 = arith.addf %180, %174 : vector<2x32xf32>
    %182 = arith.negf %181 : vector<2x32xf32>
    %183 = math.exp %182 : vector<2x32xf32>
    %cst_95 = arith.constant 1.000000e+00 : f32
    %184 = vector.broadcast %cst_95 : f32 to vector<2x32xf32>
    %185 = arith.addf %184, %183 : vector<2x32xf32>
    %186 = arith.divf %184, %185 : vector<2x32xf32>
    %c0_96 = arith.constant 0 : index
    %c5_97 = arith.constant 5 : index
    %c0_98 = arith.constant 0 : index
    %187 = vector.load %arg3[%c0_96, %c5_97, %c0_98] : memref<2x8x32xf32, #tpu.memory_space<vmem>>, vector<2x1x32xf32>
    %188 = vector.shape_cast %187 : vector<2x1x32xf32> to vector<2x32xf32>
    %189 = arith.addf %188, %175 : vector<2x32xf32>
    %190 = arith.negf %189 : vector<2x32xf32>
    %191 = math.exp %190 : vector<2x32xf32>
    %cst_99 = arith.constant 1.000000e+00 : f32
    %192 = vector.broadcast %cst_99 : f32 to vector<2x32xf32>
    %193 = arith.addf %192, %191 : vector<2x32xf32>
    %194 = arith.divf %192, %193 : vector<2x32xf32>
    %c0_100 = arith.constant 0 : index
    %c5_101 = arith.constant 5 : index
    %c0_102 = arith.constant 0 : index
    %195 = vector.load %arg4[%c0_100, %c5_101, %c0_102] : memref<2x8x32xf32, #tpu.memory_space<vmem>>, vector<2x1x32xf32>
    %196 = vector.shape_cast %195 : vector<2x1x32xf32> to vector<2x32xf32>
    %197 = arith.mulf %186, %178 : vector<2x32xf32>
    %198 = arith.addf %196, %197 : vector<2x32xf32>
    %199 = math.tanh %198 : vector<2x32xf32>
    %200 = arith.subf %169, %199 : vector<2x32xf32>
    %201 = arith.mulf %194, %200 : vector<2x32xf32>
    %202 = arith.addf %199, %201 : vector<2x32xf32>
    %c0_103 = arith.constant 0 : index
    %c5_104 = arith.constant 5 : index
    %c0_105 = arith.constant 0 : index
    %203 = vector.load %arg10[%c0_103, %c5_104, %c0_105] : memref<2x8x32xf32, #tpu.memory_space<vmem>>, vector<2x1x32xf32>
    %204 = vector.shape_cast %203 : vector<2x1x32xf32> to vector<2x32xf32>
    %205 = vector.shape_cast %202 : vector<2x32xf32> to vector<2x1x32xf32>
    tpu.vector_store %arg10[%c0_103, %c5_104, %c0_105], %205 {strides = array<i32>} : memref<2x8x32xf32, #tpu.memory_space<vmem>>, vector<2x1x32xf32>,
    %206 = arith.truncf %202 : vector<2x32xf32> to vector<2x32xbf16>
    %cst_106 = arith.constant dense<0.000000e+00> : vector<2x32xf32>
    %207 = tpu.matmul %206, %3, %cst_106 {dimension_numbers = #tpu.dot_dimension_numbers<[1], [0], [0], [1], [0, 0, 1, 1], [], []>} : vector<2x32xbf16>, vector<32x32xbf16>, vector<2x32xf32> -> vector<2x32xf32>
    %cst_107 = arith.constant dense<0.000000e+00> : vector<2x32xf32>
    %208 = tpu.matmul %206, %4, %cst_107 {dimension_numbers = #tpu.dot_dimension_numbers<[1], [0], [0], [1], [0, 0, 1, 1], [], []>} : vector<2x32xbf16>, vector<32x32xbf16>, vector<2x32xf32> -> vector<2x32xf32>
    %cst_108 = arith.constant dense<0.000000e+00> : vector<2x32xf32>
    %209 = tpu.matmul %206, %5, %cst_108 {dimension_numbers = #tpu.dot_dimension_numbers<[1], [0], [0], [1], [0, 0, 1, 1], [], []>} : vector<2x32xbf16>, vector<32x32xbf16>, vector<2x32xf32> -> vector<2x32xf32>
    %210 = vector.broadcast %6 : vector<1x32xf32> to vector<2x32xf32>
    %211 = arith.addf %209, %210 : vector<2x32xf32>
    %c0_109 = arith.constant 0 : index
    %c6 = arith.constant 6 : index
    %c0_110 = arith.constant 0 : index
    %212 = vector.load %arg2[%c0_109, %c6, %c0_110] : memref<2x8x32xf32, #tpu.memory_space<vmem>>, vector<2x1x32xf32>
    %213 = vector.shape_cast %212 : vector<2x1x32xf32> to vector<2x32xf32>
    %214 = arith.addf %213, %207 : vector<2x32xf32>
    %215 = arith.negf %214 : vector<2x32xf32>
    %216 = math.exp %215 : vector<2x32xf32>
    %cst_111 = arith.constant 1.000000e+00 : f32
    %217 = vector.broadcast %cst_111 : f32 to vector<2x32xf32>
    %218 = arith.addf %217, %216 : vector<2x32xf32>
    %219 = arith.divf %217, %218 : vector<2x32xf32>
    %c0_112 = arith.constant 0 : index
    %c6_113 = arith.constant 6 : index
    %c0_114 = arith.constant 0 : index
    %220 = vector.load %arg3[%c0_112, %c6_113, %c0_114] : memref<2x8x32xf32, #tpu.memory_space<vmem>>, vector<2x1x32xf32>
    %221 = vector.shape_cast %220 : vector<2x1x32xf32> to vector<2x32xf32>
    %222 = arith.addf %221, %208 : vector<2x32xf32>
    %223 = arith.negf %222 : vector<2x32xf32>
    %224 = math.exp %223 : vector<2x32xf32>
    %cst_115 = arith.constant 1.000000e+00 : f32
    %225 = vector.broadcast %cst_115 : f32 to vector<2x32xf32>
    %226 = arith.addf %225, %224 : vector<2x32xf32>
    %227 = arith.divf %225, %226 : vector<2x32xf32>
    %c0_116 = arith.constant 0 : index
    %c6_117 = arith.constant 6 : index
    %c0_118 = arith.constant 0 : index
    %228 = vector.load %arg4[%c0_116, %c6_117, %c0_118] : memref<2x8x32xf32, #tpu.memory_space<vmem>>, vector<2x1x32xf32>
    %229 = vector.shape_cast %228 : vector<2x1x32xf32> to vector<2x32xf32>
    %230 = arith.mulf %219, %211 : vector<2x32xf32>
    %231 = arith.addf %229, %230 : vector<2x32xf32>
    %232 = math.tanh %231 : vector<2x32xf32>
    %233 = arith.subf %202, %232 : vector<2x32xf32>
    %234 = arith.mulf %227, %233 : vector<2x32xf32>
    %235 = arith.addf %232, %234 : vector<2x32xf32>
    %c0_119 = arith.constant 0 : index
    %c6_120 = arith.constant 6 : index
    %c0_121 = arith.constant 0 : index
    %236 = vector.load %arg10[%c0_119, %c6_120, %c0_121] : memref<2x8x32xf32, #tpu.memory_space<vmem>>, vector<2x1x32xf32>
    %237 = vector.shape_cast %236 : vector<2x1x32xf32> to vector<2x32xf32>
    %238 = vector.shape_cast %235 : vector<2x32xf32> to vector<2x1x32xf32>
    tpu.vector_store %arg10[%c0_119, %c6_120, %c0_121], %238 {strides = array<i32>} : memref<2x8x32xf32, #tpu.memory_space<vmem>>, vector<2x1x32xf32>,
    %239 = arith.truncf %235 : vector<2x32xf32> to vector<2x32xbf16>
    %cst_122 = arith.constant dense<0.000000e+00> : vector<2x32xf32>
    %240 = tpu.matmul %239, %3, %cst_122 {dimension_numbers = #tpu.dot_dimension_numbers<[1], [0], [0], [1], [0, 0, 1, 1], [], []>} : vector<2x32xbf16>, vector<32x32xbf16>, vector<2x32xf32> -> vector<2x32xf32>
    %cst_123 = arith.constant dense<0.000000e+00> : vector<2x32xf32>
    %241 = tpu.matmul %239, %4, %cst_123 {dimension_numbers = #tpu.dot_dimension_numbers<[1], [0], [0], [1], [0, 0, 1, 1], [], []>} : vector<2x32xbf16>, vector<32x32xbf16>, vector<2x32xf32> -> vector<2x32xf32>
    %cst_124 = arith.constant dense<0.000000e+00> : vector<2x32xf32>
    %242 = tpu.matmul %239, %5, %cst_124 {dimension_numbers = #tpu.dot_dimension_numbers<[1], [0], [0], [1], [0, 0, 1, 1], [], []>} : vector<2x32xbf16>, vector<32x32xbf16>, vector<2x32xf32> -> vector<2x32xf32>
    %243 = vector.broadcast %6 : vector<1x32xf32> to vector<2x32xf32>
    %244 = arith.addf %242, %243 : vector<2x32xf32>
    %c0_125 = arith.constant 0 : index
    %c7 = arith.constant 7 : index
    %c0_126 = arith.constant 0 : index
    %245 = vector.load %arg2[%c0_125, %c7, %c0_126] : memref<2x8x32xf32, #tpu.memory_space<vmem>>, vector<2x1x32xf32>
    %246 = vector.shape_cast %245 : vector<2x1x32xf32> to vector<2x32xf32>
    %247 = arith.addf %246, %240 : vector<2x32xf32>
    %248 = arith.negf %247 : vector<2x32xf32>
    %249 = math.exp %248 : vector<2x32xf32>
    %cst_127 = arith.constant 1.000000e+00 : f32
    %250 = vector.broadcast %cst_127 : f32 to vector<2x32xf32>
    %251 = arith.addf %250, %249 : vector<2x32xf32>
    %252 = arith.divf %250, %251 : vector<2x32xf32>
    %c0_128 = arith.constant 0 : index
    %c7_129 = arith.constant 7 : index
    %c0_130 = arith.constant 0 : index
    %253 = vector.load %arg3[%c0_128, %c7_129, %c0_130] : memref<2x8x32xf32, #tpu.memory_space<vmem>>, vector<2x1x32xf32>
    %254 = vector.shape_cast %253 : vector<2x1x32xf32> to vector<2x32xf32>
    %255 = arith.addf %254, %241 : vector<2x32xf32>
    %256 = arith.negf %255 : vector<2x32xf32>
    %257 = math.exp %256 : vector<2x32xf32>
    %cst_131 = arith.constant 1.000000e+00 : f32
    %258 = vector.broadcast %cst_131 : f32 to vector<2x32xf32>
    %259 = arith.addf %258, %257 : vector<2x32xf32>
    %260 = arith.divf %258, %259 : vector<2x32xf32>
    %c0_132 = arith.constant 0 : index
    %c7_133 = arith.constant 7 : index
    %c0_134 = arith.constant 0 : index
    %261 = vector.load %arg4[%c0_132, %c7_133, %c0_134] : memref<2x8x32xf32, #tpu.memory_space<vmem>>, vector<2x1x32xf32>
    %262 = vector.shape_cast %261 : vector<2x1x32xf32> to vector<2x32xf32>
    %263 = arith.mulf %252, %244 : vector<2x32xf32>
    %264 = arith.addf %262, %263 : vector<2x32xf32>
    %265 = math.tanh %264 : vector<2x32xf32>
    %266 = arith.subf %235, %265 : vector<2x32xf32>
    %267 = arith.mulf %260, %266 : vector<2x32xf32>
    %268 = arith.addf %265, %267 : vector<2x32xf32>
    %c0_135 = arith.constant 0 : index
    %c7_136 = arith.constant 7 : index
    %c0_137 = arith.constant 0 : index
    %269 = vector.load %arg10[%c0_135, %c7_136, %c0_137] : memref<2x8x32xf32, #tpu.memory_space<vmem>>, vector<2x1x32xf32>
    %270 = vector.shape_cast %269 : vector<2x1x32xf32> to vector<2x32xf32>
    %271 = vector.shape_cast %268 : vector<2x32xf32> to vector<2x1x32xf32>
    tpu.vector_store %arg10[%c0_135, %c7_136, %c0_137], %271 {strides = array<i32>} : memref<2x8x32xf32, #tpu.memory_space<vmem>>, vector<2x1x32xf32>,
    %c0_138 = arith.constant 0 : index
    %c0_139 = arith.constant 0 : index
    %272 = vector.load %arg12[%c0_138, %c0_139] : memref<2x32xf32, #tpu.memory_space<vmem>>, vector<2x32xf32>
    tpu.vector_store %arg12[%c0_138, %c0_139], %268 {strides = array<i32>} : memref<2x32xf32, #tpu.memory_space<vmem>>, vector<2x32xf32>,
    %c0_i32_140 = arith.constant 0 : i32
    %273 = arith.cmpi eq, %arg1, %c0_i32_140 : i32
    %274 = arith.extui %273 : i1 to i32
    %c0_i32_141 = arith.constant 0 : i32
    %275 = arith.cmpi ne, %274, %c0_i32_141 : i32
    scf.if %275 {
      %c0_142 = arith.constant 0 : index
      %c0_143 = arith.constant 0 : index
      %276 = vector.load %arg11[%c0_142, %c0_143] : memref<2x32xf32, #tpu.memory_space<vmem>>, vector<2x32xf32>
      tpu.vector_store %arg11[%c0_142, %c0_143], %268 {strides = array<i32>} : memref<2x32xf32, #tpu.memory_space<vmem>>, vector<2x32xf32>,
    } else {
    }
    return
  }
  func.func @transform_0(%arg0: i32, %arg1: i32) -> (i32, i32, i32) {
    %c0_i32 = arith.constant 0 : i32
    %c0_i32_0 = arith.constant 0 : i32
    return %arg0, %arg1, %c0_i32 : i32, i32, i32
  }
  func.func @transform_1(%arg0: i32, %arg1: i32) -> (i32, i32, i32) {
    %c0_i32 = arith.constant 0 : i32
    %c0_i32_0 = arith.constant 0 : i32
    return %arg0, %arg1, %c0_i32 : i32, i32, i32
  }
  func.func @transform_2(%arg0: i32, %arg1: i32) -> (i32, i32, i32) {
    %c0_i32 = arith.constant 0 : i32
    %c0_i32_0 = arith.constant 0 : i32
    return %arg0, %arg1, %c0_i32 : i32, i32, i32
  }
  func.func @transform_3(%arg0: i32, %arg1: i32) -> (i32, i32) {
    %c0_i32 = arith.constant 0 : i32
    %c0_i32_0 = arith.constant 0 : i32
    return %arg0, %c0_i32 : i32, i32
  }
  func.func @transform_4(%arg0: i32, %arg1: i32) -> (i32, i32) {
    %c0_i32 = arith.constant 0 : i32
    %c0_i32_0 = arith.constant 0 : i32
    %c0_i32_1 = arith.constant 0 : i32
    return %c0_i32, %c0_i32_0 : i32, i32
  }
  func.func @transform_5(%arg0: i32, %arg1: i32) -> (i32, i32) {
    %c0_i32 = arith.constant 0 : i32
    %c0_i32_0 = arith.constant 0 : i32
    %c0_i32_1 = arith.constant 0 : i32
    return %c0_i32, %c0_i32_0 : i32, i32
  }
  func.func @transform_6(%arg0: i32, %arg1: i32) -> (i32, i32) {
    %c0_i32 = arith.constant 0 : i32
    %c0_i32_0 = arith.constant 0 : i32
    %c0_i32_1 = arith.constant 0 : i32
    return %c0_i32, %c0_i32_0 : i32, i32
  }
  func.func @transform_7(%arg0: i32, %arg1: i32) -> (i32, i32) {
    %c0_i32 = arith.constant 0 : i32
    %c0_i32_0 = arith.constant 0 : i32
    %c0_i32_1 = arith.constant 0 : i32
    return %c0_i32, %c0_i32_0 : i32, i32
  }
  func.func @transform_8(%arg0: i32, %arg1: i32) -> (i32, i32, i32) {
    %c0_i32 = arith.constant 0 : i32
    %c0_i32_0 = arith.constant 0 : i32
    return %arg0, %arg1, %c0_i32 : i32, i32, i32
  }
  func.func @transform_9(%arg0: i32, %arg1: i32) -> (i32, i32) {
    %c0_i32 = arith.constant 0 : i32
    %c0_i32_0 = arith.constant 0 : i32
    return %arg0, %c0_i32 : i32, i32
  }
}

module attributes {stable_mosaic.version = 11 : i64} {
  func.func @_matmul_bias_kernel(%arg0: i32, %arg1: i32, %arg2: i32, %arg3: memref<16x32xbf16, #tpu.memory_space<vmem>>, %arg4: memref<32x128xbf16, #tpu.memory_space<vmem>>, %arg5: memref<1x128xf32, #tpu.memory_space<vmem>>, %arg6: memref<16x128xf32, #tpu.memory_space<vmem>>, %arg7: memref<16x128xf32, #tpu.memory_space<vmem>>) attributes {dimension_semantics = [#tpu.dimension_semantics<parallel>, #tpu.dimension_semantics<parallel>, #tpu.dimension_semantics<arbitrary>], iteration_bounds = array<i64: 1, 1, 1>, scalar_prefetch = 0 : i64, scratch_operands = 1 : i64, tpu.core_type = #tpu.core_type<tc>, window_params = [{transform_indices = @transform_0, window_bounds = array<i64: 16, 32>}, {transform_indices = @transform_1, window_bounds = array<i64: 32, 128>}, {transform_indices = @transform_2, window_bounds = array<i64: 1, 128>}, {transform_indices = @transform_3, window_bounds = array<i64: 16, 128>}]} {
    %c0_i32 = arith.constant 0 : i32
    %0 = arith.cmpi eq, %arg2, %c0_i32 : i32
    %1 = arith.extui %0 : i1 to i32
    %c0_i32_0 = arith.constant 0 : i32
    %2 = arith.cmpi ne, %1, %c0_i32_0 : i32
    scf.if %2 {
      %cst_10 = arith.constant 0.000000e+00 : f32
      %12 = vector.broadcast %cst_10 : f32 to vector<16x128xf32>
      %c0_11 = arith.constant 0 : index
      %c0_12 = arith.constant 0 : index
      %13 = vector.load %arg7[%c0_11, %c0_12] : memref<16x128xf32, #tpu.memory_space<vmem>>, vector<16x128xf32>
      tpu.vector_store %arg7[%c0_11, %c0_12], %12 {strides = array<i32>} : memref<16x128xf32, #tpu.memory_space<vmem>>, vector<16x128xf32>,
    } else {
    }
    %c0 = arith.constant 0 : index
    %c0_1 = arith.constant 0 : index
    %3 = vector.load %arg7[%c0, %c0_1] : memref<16x128xf32, #tpu.memory_space<vmem>>, vector<16x128xf32>
    %c0_2 = arith.constant 0 : index
    %c0_3 = arith.constant 0 : index
    %4 = vector.load %arg3[%c0_2, %c0_3] : memref<16x32xbf16, #tpu.memory_space<vmem>>, vector<16x32xbf16>
    %c0_4 = arith.constant 0 : index
    %c0_5 = arith.constant 0 : index
    %5 = vector.load %arg4[%c0_4, %c0_5] : memref<32x128xbf16, #tpu.memory_space<vmem>>, vector<32x128xbf16>
    %cst = arith.constant dense<0.000000e+00> : vector<16x128xf32>
    %6 = tpu.matmul %4, %5, %cst {dimension_numbers = #tpu.dot_dimension_numbers<[1], [0], [0], [1], [0, 0, 1, 1], [], []>} : vector<16x32xbf16>, vector<32x128xbf16>, vector<16x128xf32> -> vector<16x128xf32>
    %7 = arith.addf %3, %6 : vector<16x128xf32>
    %c0_6 = arith.constant 0 : index
    %c0_7 = arith.constant 0 : index
    %8 = vector.load %arg7[%c0_6, %c0_7] : memref<16x128xf32, #tpu.memory_space<vmem>>, vector<16x128xf32>
    tpu.vector_store %arg7[%c0_6, %c0_7], %7 {strides = array<i32>} : memref<16x128xf32, #tpu.memory_space<vmem>>, vector<16x128xf32>,
    %c0_i32_8 = arith.constant 0 : i32
    %9 = arith.cmpi eq, %arg2, %c0_i32_8 : i32
    %10 = arith.extui %9 : i1 to i32
    %c0_i32_9 = arith.constant 0 : i32
    %11 = arith.cmpi ne, %10, %c0_i32_9 : i32
    scf.if %11 {
      %c0_10 = arith.constant 0 : index
      %c0_11 = arith.constant 0 : index
      %12 = vector.load %arg7[%c0_10, %c0_11] : memref<16x128xf32, #tpu.memory_space<vmem>>, vector<16x128xf32>
      %c0_12 = arith.constant 0 : index
      %c0_13 = arith.constant 0 : index
      %13 = vector.load %arg5[%c0_12, %c0_13] : memref<1x128xf32, #tpu.memory_space<vmem>>, vector<1x128xf32>
      %14 = vector.broadcast %13 : vector<1x128xf32> to vector<16x128xf32>
      %15 = arith.addf %12, %14 : vector<16x128xf32>
      %c0_14 = arith.constant 0 : index
      %c0_15 = arith.constant 0 : index
      %16 = vector.load %arg6[%c0_14, %c0_15] : memref<16x128xf32, #tpu.memory_space<vmem>>, vector<16x128xf32>
      tpu.vector_store %arg6[%c0_14, %c0_15], %15 {strides = array<i32>} : memref<16x128xf32, #tpu.memory_space<vmem>>, vector<16x128xf32>,
    } else {
    }
    return
  }
  func.func @transform_0(%arg0: i32, %arg1: i32, %arg2: i32) -> (i32, i32) {
    %c0_i32 = arith.constant 0 : i32
    return %arg0, %arg2 : i32, i32
  }
  func.func @transform_1(%arg0: i32, %arg1: i32, %arg2: i32) -> (i32, i32) {
    %c0_i32 = arith.constant 0 : i32
    return %arg2, %arg1 : i32, i32
  }
  func.func @transform_2(%arg0: i32, %arg1: i32, %arg2: i32) -> (i32, i32) {
    %c0_i32 = arith.constant 0 : i32
    %c0_i32_0 = arith.constant 0 : i32
    return %c0_i32, %arg1 : i32, i32
  }
  func.func @transform_3(%arg0: i32, %arg1: i32, %arg2: i32) -> (i32, i32) {
    %c0_i32 = arith.constant 0 : i32
    return %arg0, %arg1 : i32, i32
  }
}

</mosaic_0001>

<bundles_post_ra>
// kernel: first_model_forward.12
= control target key start
LH: loop header
LB: loop body
LE: loop exit
PB: predicated region body
PF: predicated region fallthrough
CT: control target
= control target key end

     0   :  { %vm25_vm0 = vcmask 261120   ;;  %v108_v9 = vmov 32.0   ;;  %s161_s0 = inlined_call_operand.vmem [shape: f32[16,32], index: 0, kind: input, shape index: {}]   ;;  %s162_s1 = inlined_call_operand.vmem [shape: bf16[16,32], index: 1, kind: input, shape index: {}]   ;;  %s163_s2 = inlined_call_operand.vmem [shape: f32[1,32], index: 2, kind: input, shape index: {}]   ;;  %s164_s3 = inlined_call_operand.vmem [shape: f32[1,32], index: 3, kind: input, shape index: {}]   ;;  %s165_s4 = inlined_call_operand.vmem [shape: f32[16,32], index: 4, kind: output, shape index: {}]  }
   0x1   :  { %v17_v0 = vld [vmem:[%s161_s0] sm:$0xff]  ;;  %v18_v5 = vld [vmem:[%s161_s0 + $0x8] sm:$0xff]  ;;  %102 = vrcp.f32 %v108_v9 }
   0x2   :  { %v96_v1 = vld [vmem:[%s162_s1] sm:$0xff]  }
   0x3   :  { %v97_v2 = vunpack.c.l.bf16 %v96_v1  ;;  %v98_v4 = vunpack.c.h.bf16 %v96_v1  ;;  %v100_v40 = vld [vmem:[%s163_s2] ss:$0 sm:$0xff] }
   0x4   :  { %v101_v43 = vld [vmem:[%s164_s3] ss:$0 sm:$0xff] }
   0x5   :  { %v23_v3 = vadd.f32 %v97_v2, %v17_v0  ;;  %v24_v7 = vadd.f32 %v98_v4, %v18_v5 }
   0x7   :  { %v26_v6 = vsel %vm25_vm0, %v23_v3, 0.0  ;;  %v29_v8 = vsel %vm25_vm0, %v24_v7, 0.0  ;;  %v103_v10 = vpop.eup %102 }
   0x8   :  { %27 = vadd.xlane.f32.xlu0 %v26_v6  ;;  %v33_v11 = vmul.f32 32.0, %v103_v10  ;;  %vm37_vm1 = vweird.f32 %v103_v10 }
   0xa   :  { %v34_v12 = vsub.f32 1.0, %v33_v11 }
   0xc   :  { %v35_v13 = vmul.f32 %v103_v10, %v34_v12 }
   0xe   :  { %v36_v14 = vadd.f32 %v103_v10, %v35_v13 }
  0x10   :  { %30 = vadd.xlane.f32.xlu0 %v29_v8  ;;  %v38_v15 = vsel %vm37_vm1, %v103_v10, %v36_v14 }
  0x7b   :  { %v28_v16 = vpop.xlane.xlu0 %27 }
  0x7c   :  { %v39_v17 = vmul.f32 %v38_v15, %v28_v16 }
  0x7e   :  { %v41_v18 = vsub.f32 %v23_v3, %v39_v17 }
  0x80   :  { %v43_v19 = vmul.f32 %v41_v18, %v41_v18 }
  0x82   :  { %v45_v20 = vsel %vm25_vm0, %v43_v19, 0.0 }
  0x83   :  { %46 = vadd.xlane.f32.xlu1 %v45_v20  ;;  %v31_v21 = vpop.xlane.xlu0 %30 }
  0x84   :  { %v40_v22 = vmul.f32 %v38_v15, %v31_v21 }
  0x86   :  { %v42_v23 = vsub.f32 %v24_v7, %v40_v22 }
  0x88   :  { %v44_v24 = vmul.f32 %v42_v23, %v42_v23 }
  0x8a   :  { %v48_v25 = vsel %vm25_vm0, %v44_v24, 0.0 }
  0x8b   :  { %49 = vadd.xlane.f32.xlu1 %v48_v25 }
  0xf6   :  { %v47_v26 = vpop.xlane.xlu1 %46 }
  0xf7   :  { %v51_v27 = vmul.f32 %v47_v26, %v38_v15 }
  0xf9   :  { %v53_v28 = vadd.f32 1e-05, %v51_v27 }
  0xfb   :  { %104 = vrsqrt.f32 %v53_v28  ;;  %vm61_vm3 = vweird.f32 %v53_v28 }
  0xfe   :  { %v50_v29 = vpop.xlane.xlu1 %49 }
  0xff   :  { %v52_v30 = vmul.f32 %v50_v29, %v38_v15 }
 0x101   :  { %v105_v31 = vpop.eup %104  ;;  %v54_v32 = vadd.f32 1e-05, %v52_v30 }
 0x102   :  { %v56_v33 = vmul.f32 %v105_v31, %v53_v28  ;;  %vm62_vm2 = vweird.f32 %v105_v31 }
 0x103   :  { %106 = vrsqrt.f32 %v54_v32  ;;  %vm63_vm4 = vmor %vm61_vm3, %vm62_vm2  ;;  %vm71_vm6 = vweird.f32 %v54_v32 }
 0x104   :  { %v57_v34 = vmul.f32 %v105_v31, %v56_v33 }
 0x106   :  { %v58_v35 = vmul.f32 0.5, %v57_v34 }
 0x108   :  { %v59_v36 = vsub.f32 1.5, %v58_v35 }
 0x109   :  { %v107_v37 = vpop.eup %106 }
 0x10a   :  { %v60_v38 = vmul.f32 %v105_v31, %v59_v36  ;;  %v66_v39 = vmul.f32 %v107_v37, %v54_v32  ;;  %vm72_vm5 = vweird.f32 %v107_v37 }
 0x10b   :  { %vm73_vm7 = vmor %vm71_vm6, %vm72_vm5 }
 0x10c   :  { %v64_v41 = vsel %vm63_vm4, %v105_v31, %v60_v38  ;;  %v67_v42 = vmul.f32 %v107_v37, %v66_v39 }
 0x10d   :  { %v75_v44 = vmul.f32 %v64_v41, %v41_v18 }
 0x10e   :  { %v68_v45 = vmul.f32 0.5, %v67_v42 }
 0x10f   :  { %v81_v46 = vmul.f32 %v100_v40, %v75_v44 }
 0x110   :  { %v69_v47 = vsub.f32 1.5, %v68_v45 }
 0x111   :  { %v87_v48 = vadd.f32 %v101_v43, %v81_v46 }
 0x112   :  { %v70_v49 = vmul.f32 %v107_v37, %v69_v47 }
 0x113   :  { %89 = vst.msk [vmem:[%s165_s4] sm:$0xff] %vm25_vm0, %v87_v48 }
 0x114   :  { %v74_v50 = vsel %vm73_vm7, %v107_v37, %v70_v49 }
 0x115   :  { %v76_v51 = vmul.f32 %v74_v50, %v42_v23 }
 0x117   :  { %v82_v52 = vmul.f32 %v100_v40, %v76_v51 }
 0x119   :  { %v88_v53 = vadd.f32 %v101_v43, %v82_v52 }
 0x11b   :  { %90 = vst.msk [vmem:[%s165_s4 + $0x8] sm:$0xff] %vm25_vm0, %v88_v53 }

// kernel: first_model_forward.10
= control target key start
LH: loop header
LB: loop body
LE: loop exit
PB: predicated region body
PF: predicated region fallthrough
CT: control target
= control target key end

     0   :  { %vm19_vm0 = vcmask 261120   ;;  %v107_v1 = vmov 0.0   ;;  %vm82_vm1 = vcmask 257024   ;;  %s151_s1 = inlined_call_operand.vmem [shape: bf16[32,32], index: 1, kind: input, shape index: {}]   ;;  %s152_s2 = inlined_call_operand.vmem [shape: f32[1,32], index: 2, kind: input, shape index: {}]   ;;  %s153_s0 = inlined_call_operand.vmem [shape: bf16[16,32], index: 0, kind: input, shape index: {}]   ;;  %s154_s3 = inlined_call_operand.vmem [shape: bf16[16,32], index: 3, kind: output, shape index: {}]  }
   0x1   :  { %v104_v0 = vld [vmem:[%s151_s1 + $0x8] sm:$0xff]  ;;  %20 = vst.msk [vmem:[#allocation2] sm:$0xff] %vm19_vm0, %v107_v1  ;;  %v103_v2 = vld [vmem:[%s151_s1] sm:$0xff] }
   0x2   :  { %21 = vst.msk [vmem:[#allocation2 + $0x8] sm:$0xff] %vm19_vm0, %v107_v1  ;;  %57 = vmatpush.bf16.msra.mxu0 %v104_v0  ;;  %v102_v3 = vld [vmem:[%s153_s0] sm:$0xff] }
   0x3   :  { %v106_v8 = vld [vmem:[%s152_s2] ss:$0 sm:$0xff] }
   0x6   :  { %58 = vmatpush.bf16.msra.mxu0 %v103_v2 }
   0x8   :  { %v22_v4 = vld [vmem:[#allocation2] sm:$0xff] }
   0x9   :  { %101 = vmatmul.msk.bf16.vlgmr.msra.gmra.mxu0 %vm19_vm0, %v102_v3  ;;  %v23_v7 = vld [vmem:[#allocation2 + $0x8] sm:$0xff] }
  0x86   :  { %v60_v5 = vpop.f32.mrf.mxu0 }
  0x87   :  { %v65_v6 = vadd.f32 %v60_v5, %v22_v4 }
  0x89   :  { %67 = vst.msk [vmem:[#allocation2] sm:$0xff] %vm19_vm0, %v65_v6 }
  0x8e   :  { %v62_v9 = vpop.f32.mrf.mxu0 }
  0x8f   :  { %v66_v10 = vadd.f32 %v62_v9, %v23_v7 }
  0x90   :  { %v72_v11 = vld [vmem:[#allocation2] sm:$0xff] }
  0x91   :  { %v78_v12 = vadd.f32 %v106_v8, %v72_v11  ;;  %68 = vst.msk [vmem:[#allocation2 + $0x8] sm:$0xff] %vm19_vm0, %v66_v10 }
  0x93   :  { %v80_v13 = vpack.c.bf16 %v78_v12, %v78_v12 }
  0x95   :  { %83 = vst.msk [vmem:[%s154_s3] sm:$0xf] %vm82_vm1, %v80_v13 }
  0x98   :  { %v73_v14 = vld [vmem:[#allocation2 + $0x8] sm:$0xff] }
  0x99   :  { %v79_v15 = vadd.f32 %v106_v8, %v73_v14 }
  0x9b   :  { %v81_v16 = vpack.c.bf16 %v79_v15, %v79_v15 }
  0x9d   :  { %84 = vst.msk [vmem:[%s154_s3 + $0x4] sm:$0xf] %vm82_vm1, %v81_v16 }

// kernel: first_model_forward.9
= control target key start
LH: loop header
LB: loop body
LE: loop exit
PB: predicated region body
PF: predicated region fallthrough
CT: control target
= control target key end

     0   :  { %vm19_vm0 = vcmask 261120   ;;  %v104_v1 = vmov 0.0   ;;  %s150_s1 = inlined_call_operand.vmem [shape: bf16[32,32], index: 1, kind: input, shape index: {}]   ;;  %s151_s2 = inlined_call_operand.vmem [shape: f32[1,32], index: 2, kind: input, shape index: {}]   ;;  %s152_s0 = inlined_call_operand.vmem [shape: bf16[16,32], index: 0, kind: input, shape index: {}]   ;;  %s153_s3 = inlined_call_operand.vmem [shape: f32[16,32], index: 3, kind: output, shape index: {}]  }
   0x1   :  { %v101_v0 = vld [vmem:[%s150_s1 + $0x8] sm:$0xff]  ;;  %20 = vst.msk [vmem:[#allocation2] sm:$0xff] %vm19_vm0, %v104_v1  ;;  %v100_v2 = vld [vmem:[%s150_s1] sm:$0xff] }
   0x2   :  { %21 = vst.msk [vmem:[#allocation2 + $0x8] sm:$0xff] %vm19_vm0, %v104_v1  ;;  %57 = vmatpush.bf16.msra.mxu0 %v101_v0  ;;  %v99_v3 = vld [vmem:[%s152_s0] sm:$0xff] }
   0x3   :  { %v103_v8 = vld [vmem:[%s151_s2] ss:$0 sm:$0xff] }
   0x6   :  { %58 = vmatpush.bf16.msra.mxu0 %v100_v2 }
   0x8   :  { %v22_v4 = vld [vmem:[#allocation2] sm:$0xff] }
   0x9   :  { %98 = vmatmul.msk.bf16.vlgmr.msra.gmra.mxu0 %vm19_vm0, %v99_v3  ;;  %v23_v7 = vld [vmem:[#allocation2 + $0x8] sm:$0xff] }
  0x86   :  { %v60_v5 = vpop.f32.mrf.mxu0 }
  0x87   :  { %v65_v6 = vadd.f32 %v60_v5, %v22_v4 }
  0x89   :  { %67 = vst.msk [vmem:[#allocation2] sm:$0xff] %vm19_vm0, %v65_v6 }
  0x8e   :  { %v62_v9 = vpop.f32.mrf.mxu0 }
  0x8f   :  { %v66_v10 = vadd.f32 %v62_v9, %v23_v7 }
  0x90   :  { %v72_v11 = vld [vmem:[#allocation2] sm:$0xff] }
  0x91   :  { %v78_v12 = vadd.f32 %v103_v8, %v72_v11  ;;  %68 = vst.msk [vmem:[#allocation2 + $0x8] sm:$0xff] %vm19_vm0, %v66_v10 }
  0x93   :  { %80 = vst.msk [vmem:[%s153_s3] sm:$0xff] %vm19_vm0, %v78_v12 }
  0x98   :  { %v73_v13 = vld [vmem:[#allocation2 + $0x8] sm:$0xff] }
  0x99   :  { %v79_v14 = vadd.f32 %v103_v8, %v73_v13 }
  0x9b   :  { %81 = vst.msk [vmem:[%s153_s3 + $0x8] sm:$0xff] %vm19_vm0, %v79_v14 }

// kernel: first_model_forward.13
= control target key start
LH: loop header
LB: loop body
LE: loop exit
PB: predicated region body
PF: predicated region fallthrough
CT: control target
= control target key end

     0   :  { %vm46_vm0 = vcmask 261120   ;;  %s140_s1 = inlined_call_operand.vmem [shape: bf16[32,128], index: 1, kind: input, shape index: {}]   ;;  %s141_s2 = inlined_call_operand.vmem [shape: f32[1,128], index: 2, kind: input, shape index: {}]   ;;  %s142_s0 = inlined_call_operand.vmem [shape: bf16[16,32], index: 0, kind: input, shape index: {}]   ;;  %s143_s3 = inlined_call_operand.vmem [shape: f32[16,128], index: 3, kind: output, shape index: {}]  }
   0x1   :  { %v100_v0 = vld [vmem:[%s140_s1 + $0x8] sm:$0xff]  ;;  %v99_v1 = vld [vmem:[%s140_s1] sm:$0xff] }
   0x2   :  { %56 = vmatpush.bf16.msra.mxu0 %v100_v0  ;;  %v98_v2 = vld [vmem:[%s142_s0] sm:$0xff] }
   0x3   :  { %v101_v3 = vld [vmem:[%s141_s2] ss:$0 sm:$0xff] }
   0x6   :  { %57 = vmatpush.bf16.msra.mxu0 %v99_v1 }
   0x9   :  { %97 = vmatmul.msk.bf16.vlgmr.msra.gmra.mxu0 %vm46_vm0, %v98_v2 }
  0x86   :  { %v59_v4 = vpop.f32.mrf.mxu0 }
  0x87   :  { %v77_v5 = vadd.f32 %v101_v3, %v59_v4 }
  0x89   :  { %79 = vst [vmem:[%s143_s3] sm:$0xff] %v77_v5 }
  0x8e   :  { %v61_v6 = vpop.f32.mrf.mxu0 }
  0x8f   :  { %v78_v7 = vadd.f32 %v101_v3, %v61_v6 }
  0x91   :  { %80 = vst [vmem:[%s143_s3 + $0x8] sm:$0xff] %v78_v7 }

// kernel: first_model_forward.11
= control target key start
LH: loop header
LB: loop body
LE: loop exit
PB: predicated region body
PF: predicated region fallthrough
CT: control target
= control target key end

     0   :  { %vm38_vm0 = vcmask 254976   ;;  %s2404_s0 = inlined_call_operand.vmem [shape: f32[2,8,32], index: 0, kind: input, shape index: {}]   ;;  %s2405_s1 = inlined_call_operand.vmem [shape: f32[2,8,32], index: 1, kind: input, shape index: {}]   ;;  %s2406_s2 = inlined_call_operand.vmem [shape: f32[2,8,32], index: 2, kind: input, shape index: {}]   ;;  %s2407_s3 = inlined_call_operand.vmem [shape: f32[2,32], index: 3, kind: input, shape index: {}]   ;;  %s2408_s4 = inlined_call_operand.vmem [shape: bf16[32,32], index: 4, kind: input, shape index: {}]   ;;  %s2409_s5 = inlined_call_operand.vmem [shape: bf16[32,32], index: 5, kind: input, shape index: {}]   ;;  %s2410_s6 = inlined_call_operand.vmem [shape: bf16[32,32], index: 6, kind: input, shape index: {}]   ;;  %s2411_s7 = inlined_call_operand.vmem [shape: f32[1,32], index: 7, kind: input, shape index: {}]   ;;  %s2412_s8 = inlined_call_operand.vmem [shape: f32[2,8,32], index: 8, kind: output, shape index: {0}]   ;;  %s2413_s9 = inlined_call_operand.hbm [shape: f32[2,32], index: 9, kind: output, shape index: {1}]  }
   0x1   :  { %v1766_v0 = vld [vmem:[%s2408_s4 + $0x8] sm:$0xff]  ;;  %v37_v2 = vld [vmem:[%s2407_s3] sm:$0x3] }
   0x2   :  { %v1771_v1 = vld [vmem:[%s2409_s5 + $0x8] sm:$0xff]  ;;  %77 = vmatpush.bf16.msra.mxu0 %v1766_v0  ;;  %v1785_v4 = vld [vmem:[%s2408_s4] sm:$0xff]  ;;  %39 = vst.msk [vmem:[#allocation2] sm:$0x3] %vm38_vm0, %v37_v2  ;;  %277 = vmatpush.bf16.msra.mxu3 %v1766_v0 }
   0x3   :  { %v1779_v3 = vld [vmem:[%s2410_s6 + $0x8] sm:$0xff]  ;;  %102 = vmatpush.bf16.msra.mxu1 %v1771_v1  ;;  %v1792_v5 = vld [vmem:[%s2409_s5] sm:$0xff] }
   0x4   :  { %130 = vmatpush.bf16.msra.mxu2 %v1779_v3  ;;  %v1798_v6 = vld [vmem:[%s2410_s6] sm:$0xff] }
   0x5   :  { %15 = vsyncpa [#allocation4], 0  ;;  %vm67_vm1 = vcmask 261120   ;;  %v137_v9 = vld [vmem:[%s2404_s0] sm:$0x1]  ;;  %vm244_vm15 = vcmask 1041409  }
   0x6   :  { %78 = vmatpush.bf16.msra.mxu0 %v1785_v4  ;;  %278 = vmatpush.bf16.msra.mxu3 %v1785_v4  ;;  %v183_v10 = vld [vmem:[%s2405_s1] sm:$0x1]  ;;  %v138_v12 = vld [vmem:[%s2404_s0 + $0x8] sm:$0x1]  ;;  %s1712_s19 = smov [#allocation3]   ;;  %s1420_s21 = sshll.u32 %s2413_s9, 4  ;;  %s1421_s21 = int_to_ptr.hbm [resolvable:$true] %s1420_s21 }
   0x7   :  { %103 = vmatpush.bf16.msra.mxu1 %v1792_v5  ;;  %v184_v14 = vld [vmem:[%s2405_s1 + $0x8] sm:$0x1]  ;;  %v1846_v38 = vld [vmem:[%s2411_s7] ss:$0 sm:$0xff] }
   0x8   :  { %131 = vmatpush.bf16.msra.mxu2 %v1798_v6 }
   0x9   :  { %v1807_v7 = vld [vmem:[#allocation2] sm:$0x3] }
   0xa   :  { %290 = vmatpush.bf16.msrb.mxu0 %v1771_v1  ;;  %453 = vmatpush.bf16.msrb.mxu3 %v1771_v1  ;;  %v54_v8 = vpack.c.bf16 %v1807_v7, %v1807_v7 }
   0xb   :  { %303 = vmatpush.bf16.msrb.mxu1 %v1779_v3 }
   0xc   :  { %440 = vmatpush.bf16.msrb.mxu2 %v1766_v0  ;;  %1439 = vmatmul.msk.bf16.vlgmr.msra.gmra.mxu0 %vm67_vm1, %v54_v8 }
   0xd   :  { %1448 = vmatmul.msk.bf16.vlgmr.msra.gmra.mxu1 %vm67_vm1, %v54_v8  ;;  %1457 = vmatmul.msk.bf16.vlgmr.msra.gmra.mxu2 %vm67_vm1, %v54_v8  ;;  %v229_v8 = vld [vmem:[%s2406_s2] sm:$0x1] }
   0xe   :  { %291 = vmatpush.bf16.msrb.mxu0 %v1792_v5  ;;  %454 = vmatpush.bf16.msrb.mxu3 %v1792_v5 }
   0xf   :  { %304 = vmatpush.bf16.msrb.mxu1 %v1798_v6 }
  0x10   :  { %441 = vmatpush.bf16.msrb.mxu2 %v1785_v4 }
  0x12   :  { %466 = vmatpush.bf16.msra.mxu0 %v1779_v3 }
  0x13   :  { %603 = vmatpush.bf16.msra.mxu1 %v1766_v0 }
  0x14   :  { %616 = vmatpush.bf16.msra.mxu2 %v1771_v1 }
  0x16   :  { %467 = vmatpush.bf16.msra.mxu0 %v1798_v6 }
  0x17   :  { %604 = vmatpush.bf16.msra.mxu1 %v1785_v4 }
  0x18   :  { %617 = vmatpush.bf16.msra.mxu2 %v1792_v5 }
  0x89   :  { %v80_v11 = vpop.f32.mrf.mxu0 }
  0x8a   :  { %v105_v13 = vpop.f32.mrf.mxu1  ;;  %v140_v15 = vrot.slane %v80_v11, 1  ;;  %v143_v16 = vadd.f32 %v137_v9, %v80_v11  ;;  %v230_v9 = vld [vmem:[%s2406_s2 + $0x8] sm:$0x1] }
  0x8b   :  { %v186_v17 = vrot.slane %v105_v13, 1  ;;  %v189_v18 = vadd.f32 %v183_v10, %v105_v13 }
  0x8c   :  { %v144_v19 = vadd.f32 %v140_v15, %v138_v12  ;;  %v1458_v20 = vmul.f32 -1.442695, %v143_v16 }
  0x8d   :  { %v190_v21 = vadd.f32 %v186_v17, %v184_v14  ;;  %v1460_v22 = vmul.f32 -1.442695, %v189_v18 }
  0x8e   :  { %1519 = vpow2.f32 %v1458_v20  ;;  %v1459_v23 = vmul.f32 -1.442695, %v144_v19 }
  0x8f   :  { %v1461_v24 = vmul.f32 -1.442695, %v190_v21  ;;  %1521 = vpow2.f32 %v1460_v22 }
  0x90   :  { %1523 = vpow2.f32 %v1459_v23  ;;  %v133_v25 = vpop.f32.mrf.mxu2 }
  0x91   :  { %v82_v26 = vpop.f32.mrf.mxu0  ;;  %1525 = vpow2.f32 %v1461_v24  ;;  %v134_v43 = vadd.f32 %v1846_v38, %v133_v25 }
  0x92   :  { %v107_v27 = vpop.f32.mrf.mxu1 }
  0x93   :  { %v232_v55 = vrot.slane %v134_v43, 1 }
  0x94   :  { %v1520_v28 = vpop.eup %1519 }
  0x95   :  { %v1522_v29 = vpop.eup %1521  ;;  %v151_v30 = vadd.f32 1.0, %v1520_v28 }
  0x96   :  { %v1524_v31 = vpop.eup %1523  ;;  %v1838_v35 = vadd.f32 1.0, %v1522_v29 }
  0x97   :  { %v152_v32 = vadd.f32 1.0, %v1524_v31  ;;  %1527 = vrcp.f32 %v151_v30  ;;  %v1526_v33 = vpop.eup %1525  ;;  %v162_v44 = vand.u32 2147483647, %v151_v30  ;;  %v164_v45 = vand.u32 2147483648, %v151_v30 }
  0x98   :  { %v135_v34 = vpop.f32.mrf.mxu2  ;;  %v1840_v36 = vadd.f32 1.0, %v1526_v33  ;;  %vm158_vm3 = vweird.f32 %v151_v30  ;;  %vm204_vm10 = vweird.f32 %v1838_v35  ;;  %v210_v17 = vand.u32 2147483648, %v1838_v35 }
  0x99   :  { %1529 = vrcp.f32 %v152_v32  ;;  %v179_v49 = vand.u32 2147483648, %v152_v32  ;;  %v177_v52 = vand.u32 2147483647, %v152_v32  ;;  %vm163_vm6 = vcmp.eq.f32.partialorder %v162_v44, 8.507059e+37 }
  0x9a   :  { %1531 = vrcp.f32 %v1838_v35  ;;  %v165_v54 = vor.u32 1.1754944e-38, %v164_v45  ;;  %vm173_vm7 = vweird.f32 %v152_v32  ;;  %v208_v19 = vand.u32 2147483647, %v1838_v35 }
  0x9b   :  { %1533 = vrcp.f32 %v1840_v36  ;;  %v180_v60 = vor.u32 1.1754944e-38, %v179_v49  ;;  %vm178_vm9 = vcmp.eq.f32.partialorder %v177_v52, 8.507059e+37  ;;  %vm219_vm12 = vweird.f32 %v1840_v36  ;;  %v357_v49 = vld [vmem:[%s2405_s1 + $0x9] sm:$0x1] }
  0x9c   :  { %v225_v21 = vand.u32 2147483648, %v1840_v36  ;;  %v223_v24 = vand.u32 2147483647, %v1840_v36  ;;  %v211_v25 = vor.u32 1.1754944e-38, %v210_v17 }
  0x9d   :  { %v1528_v37 = vpop.eup %1527 }
  0x9e   :  { %v154_v39 = vmul.f32 %v1528_v37, %v151_v30  ;;  %vm159_vm2 = vweird.f32 %v1528_v37  ;;  %v226_v29 = vor.u32 1.1754944e-38, %v225_v21 }
  0x9f   :  { %v1530_v40 = vpop.eup %1529  ;;  %vm160_vm5 = vmor %vm158_vm3, %vm159_vm2  ;;  %vm209_vm3 = vcmp.eq.f32.partialorder %v208_v19, 8.507059e+37 }
  0xa0   :  { %v155_v41 = vsub.f32 1.0, %v154_v39  ;;  %v169_v42 = vmul.f32 %v1530_v40, %v152_v32  ;;  %v1532_v48 = vpop.eup %1531  ;;  %vm174_vm4 = vweird.f32 %v1530_v40 }
  0xa1   :  { %v1534_v53 = vpop.eup %1533  ;;  %v200_v56 = vmul.f32 %v1532_v48, %v1838_v35  ;;  %vm175_vm8 = vmor %vm173_vm7, %vm174_vm4  ;;  %vm205_vm11 = vweird.f32 %v1532_v48  ;;  %vm224_vm4 = vcmp.eq.f32.partialorder %v223_v24, 8.507059e+37 }
  0xa2   :  { %v156_v46 = vmul.f32 %v1528_v37, %v155_v41  ;;  %v170_v47 = vsub.f32 1.0, %v169_v42  ;;  %v215_v61 = vmul.f32 %v1534_v53, %v1840_v36  ;;  %vm220_vm13 = vweird.f32 %v1534_v53  ;;  %vm1862_vm14 = vmor %vm204_vm10, %vm205_vm11 }
  0xa3   :  { %v201_v10 = vsub.f32 1.0, %v200_v56  ;;  %vm221_vm2 = vmor %vm219_vm12, %vm220_vm13 }
  0xa4   :  { %v157_v50 = vadd.f32 %v1528_v37, %v156_v46  ;;  %v171_v51 = vmul.f32 %v1530_v40, %v170_v47  ;;  %v216_v12 = vsub.f32 1.0, %v215_v61  ;;  %v356_v47 = vld [vmem:[%s2405_s1 + $0x1] sm:$0x1] }
  0xa5   :  { %v202_v15 = vmul.f32 %v1532_v48, %v201_v10 }
  0xa6   :  { %v161_v57 = vsel %vm160_vm5, %v1528_v37, %v157_v50  ;;  %v172_v58 = vadd.f32 %v1530_v40, %v171_v51  ;;  %v217_v16 = vmul.f32 %v1534_v53, %v216_v12  ;;  %vm256_vm5 = vcmask 253952  }
  0xa7   :  { %v166_v59 = vsel %vm163_vm6, %v165_v54, %v161_v57  ;;  %v203_v18 = vadd.f32 %v1532_v48, %v202_v15 }
  0xa8   :  { %v176_v62 = vsel %vm175_vm8, %v1530_v40, %v172_v58  ;;  %v235_v63 = vmul.f32 %v166_v59, %v134_v43  ;;  %v218_v23 = vadd.f32 %v1534_v53, %v217_v16  ;;  %v311_v58 = vld [vmem:[%s2404_s0 + $0x9] sm:$0x1] }
  0xa9   :  { %v181_v2 = vsel %vm178_vm9, %v180_v60, %v176_v62  ;;  %v207_v28 = vsel %vm1862_vm14, %v1532_v48, %v203_v18 }
  0xaa   :  { %v236_v11 = vmul.f32 %v232_v55, %v181_v2  ;;  %v237_v13 = vadd.f32 %v235_v63, %v229_v8  ;;  %v222_v31 = vsel %vm221_vm2, %v1534_v53, %v218_v23  ;;  %v212_v33 = vsel %vm209_vm3, %v211_v25, %v207_v28  ;;  %v310_v55 = vld [vmem:[%s2404_s0 + $0x1] sm:$0x1] }
  0xab   :  { %v227_v36 = vsel %vm224_vm4, %v226_v29, %v222_v31 }
  0xac   :  { %v238_v14 = vadd.f32 %v236_v11, %v230_v9 }
  0xae   :  { %1535 = vtanh.f32 %v238_v14 }
  0xaf   :  { %1537 = vtanh.f32 %v237_v13 }
  0xb4   :  { %v1536_v22 = vpop.eup %1535 }
  0xb5   :  { %v243_v26 = vrot.slane %v1536_v22, 7  ;;  %v1538_v27 = vpop.eup %1537 }
  0xb7   :  { %v245_v30 = vsel %vm244_vm15, %v243_v26, %v1538_v27 }
  0xb8   :  { %v247_v32 = vsub.f32 %v1807_v7, %v245_v30 }
  0xba   :  { %v249_v34 = vrot.slane %v247_v32, 1  ;;  %v252_v35 = vmul.f32 %v247_v32, %v212_v33 }
  0xbc   :  { %v253_v37 = vmul.f32 %v249_v34, %v227_v36  ;;  %v1872_v39 = vadd.f32 %v1538_v27, %v252_v35 }
  0xbe   :  { %v1874_v40 = vadd.f32 %v1536_v22, %v253_v37  ;;  %257 = vst.msk [vmem:[%s2412_s8] sm:$0x1] %vm256_vm5, %v1872_v39  ;;  %v259_v7 = vpack.c.bf16 %v1872_v39, %v1872_v39 }
  0xc0   :  { %258 = vst.msk [vmem:[%s2412_s8 + $0x8] sm:$0x1] %vm256_vm5, %v1874_v40  ;;  %v260_v41 = vpack.c.bf16 %v1874_v40, %v1874_v40  ;;  %v263_v43 = vunpack.c.l.b16 %v259_v7 }
  0xc2   :  { %v264_v42 = vunpack.c.l.b16 %v260_v41 }
  0xc4   :  { %v265_v44 = vrot.slane %v264_v42, 7 }
  0xc6   :  { %v266_v45 = vsel %vm244_vm15, %v265_v44, %v263_v43 }
  0xc7   :  { %v267_v46 = vpack.c.b16 %v266_v45, %v266_v45  ;;  %v402_v45 = vld [vmem:[%s2406_s2 + $0x1] sm:$0x1] }
  0xc9   :  { %1462 = vmatmul.msk.bf16.vlgmr.msra.gmra.mxu3 %vm67_vm1, %v267_v46  ;;  %1463 = vmatmul.msk.bf16.vlgmr.msrb.gmra.mxu0 %vm67_vm1, %v267_v46 }
  0xca   :  { %1464 = vmatmul.msk.bf16.vlgmr.msrb.gmra.mxu1 %vm67_vm1, %v267_v46  ;;  %629 = vmatpush.bf16.msra.mxu3 %v1779_v3 }
  0xcb   :  { %766 = vmatpush.bf16.msrb.mxu0 %v1766_v0  ;;  %779 = vmatpush.bf16.msrb.mxu1 %v1771_v1 }
  0xce   :  { %630 = vmatpush.bf16.msra.mxu3 %v1798_v6 }
  0xcf   :  { %767 = vmatpush.bf16.msrb.mxu0 %v1785_v4  ;;  %780 = vmatpush.bf16.msrb.mxu1 %v1792_v5 }
 0x146   :  { %v293_v48 = vpop.f32.mrf.mxu0 }
 0x147   :  { %v359_v50 = vrot.slane %v293_v48, 1  ;;  %v362_v51 = vadd.f32 %v356_v47, %v293_v48  ;;  %v306_v52 = vpop.f32.mrf.mxu1 }
 0x148   :  { %v307_v31 = vadd.f32 %v1846_v38, %v306_v52 }
 0x149   :  { %v363_v53 = vadd.f32 %v359_v50, %v357_v49  ;;  %v1467_v54 = vmul.f32 -1.442695, %v362_v51  ;;  %v403_v51 = vld [vmem:[%s2406_s2 + $0x9] sm:$0x1] }
 0x14a   :  { %v405_v46 = vrot.slane %v307_v31, 1 }
 0x14b   :  { %v1468_v56 = vmul.f32 -1.442695, %v363_v53  ;;  %1539 = vpow2.f32 %v1467_v54 }
 0x14c   :  { %v280_v57 = vpop.f32.mrf.mxu3 }
 0x14d   :  { %v313_v59 = vrot.slane %v280_v57, 1  ;;  %v316_v60 = vadd.f32 %v310_v55, %v280_v57  ;;  %1541 = vpow2.f32 %v1468_v56 }
 0x14e   :  { %v295_v61 = vpop.f32.mrf.mxu0 }
 0x14f   :  { %v317_v62 = vadd.f32 %v313_v59, %v311_v58  ;;  %v1465_v63 = vmul.f32 -1.442695, %v316_v60  ;;  %v308_v2 = vpop.f32.mrf.mxu1 }
 0x151   :  { %1543 = vpow2.f32 %v1465_v63  ;;  %v1466_v8 = vmul.f32 -1.442695, %v317_v62  ;;  %v1540_v9 = vpop.eup %1539 }
 0x152   :  { %v1912_v13 = vadd.f32 1.0, %v1540_v9 }
 0x153   :  { %1545 = vpow2.f32 %v1466_v8  ;;  %v1542_v11 = vpop.eup %1541 }
 0x154   :  { %v282_v10 = vpop.f32.mrf.mxu3  ;;  %v1914_v16 = vadd.f32 1.0, %v1542_v11  ;;  %v383_v57 = vand.u32 2147483648, %v1912_v13  ;;  %vm377_vm2 = vweird.f32 %v1912_v13  ;;  %v381_v58 = vand.u32 2147483647, %v1912_v13 }
 0x156   :  { %v398_v60 = vand.u32 2147483648, %v1914_v16  ;;  %v396_v62 = vand.u32 2147483647, %v1914_v16  ;;  %v384_v2 = vor.u32 1.1754944e-38, %v383_v57 }
 0x157   :  { %v1544_v12 = vpop.eup %1543 }
 0x158   :  { %v324_v14 = vadd.f32 1.0, %v1544_v12  ;;  %v399_v12 = vor.u32 1.1754944e-38, %v398_v60 }
 0x159   :  { %v1546_v15 = vpop.eup %1545 }
 0x15a   :  { %v325_v17 = vadd.f32 1.0, %v1546_v15  ;;  %1547 = vrcp.f32 %v324_v14  ;;  %v337_v26 = vand.u32 2147483648, %v324_v14  ;;  %v335_v28 = vand.u32 2147483647, %v324_v14 }
 0x15b   :  { %1549 = vrcp.f32 %v1912_v13  ;;  %vm331_vm7 = vweird.f32 %v324_v14 }
 0x15c   :  { %1551 = vrcp.f32 %v325_v17  ;;  %v352_v32 = vand.u32 2147483648, %v325_v17  ;;  %v350_v35 = vand.u32 2147483647, %v325_v17  ;;  %v338_v37 = vor.u32 1.1754944e-38, %v337_v26  ;;  %v519_v26 = vld [vmem:[%s2405_s1 + $0x2] sm:$0x1] }
 0x15d   :  { %1553 = vrcp.f32 %v1914_v16  ;;  %vm336_vm10 = vcmp.eq.f32.partialorder %v335_v28, 8.507059e+37  ;;  %vm346_vm11 = vweird.f32 %v325_v17  ;;  %v474_v28 = vld [vmem:[%s2404_s0 + $0xa] sm:$0x1] }
 0x15e   :  { %v353_v44 = vor.u32 1.1754944e-38, %v352_v32  ;;  %vm351_vm13 = vcmp.eq.f32.partialorder %v350_v35, 8.507059e+37 }
 0x160   :  { %v1548_v18 = vpop.eup %1547 }
 0x161   :  { %v1918_v19 = vpop.eup %1549  ;;  %v327_v20 = vmul.f32 %v1548_v18, %v324_v14  ;;  %vm332_vm6 = vweird.f32 %v1548_v18 }
 0x162   :  { %v1552_v21 = vpop.eup %1551  ;;  %v373_v25 = vmul.f32 %v1918_v19, %v1912_v13  ;;  %vm333_vm9 = vmor %vm331_vm7, %vm332_vm6  ;;  %vm378_vm14 = vweird.f32 %v1918_v19  ;;  %vm392_vm6 = vweird.f32 %v1914_v16 }
 0x163   :  { %v1920_v22 = vpop.eup %1553  ;;  %v328_v23 = vsub.f32 1.0, %v327_v20  ;;  %v342_v24 = vmul.f32 %v1552_v21, %v325_v17  ;;  %vm347_vm8 = vweird.f32 %v1552_v21  ;;  %vm379_vm4 = vmor %vm377_vm2, %vm378_vm14 }
 0x164   :  { %v388_v30 = vmul.f32 %v1920_v22, %v1914_v16  ;;  %v374_v36 = vsub.f32 1.0, %v373_v25  ;;  %vm348_vm12 = vmor %vm346_vm11, %vm347_vm8  ;;  %vm393_vm3 = vweird.f32 %v1920_v22  ;;  %vm382_vm8 = vcmp.eq.f32.partialorder %v381_v58, 8.507059e+37  ;;  %v473_v25 = vld [vmem:[%s2404_s0 + $0x2] sm:$0x1] }
 0x165   :  { %v329_v27 = vmul.f32 %v1548_v18, %v328_v23  ;;  %v343_v29 = vsub.f32 1.0, %v342_v24  ;;  %vm394_vm7 = vmor %vm392_vm6, %vm393_vm3 }
 0x166   :  { %v389_v42 = vsub.f32 1.0, %v388_v30  ;;  %v375_v49 = vmul.f32 %v1918_v19, %v374_v36  ;;  %v520_v30 = vld [vmem:[%s2405_s1 + $0xa] sm:$0x1] }
 0x167   :  { %v330_v33 = vadd.f32 %v1548_v18, %v329_v27  ;;  %v344_v34 = vmul.f32 %v1552_v21, %v343_v29 }
 0x168   :  { %v390_v54 = vmul.f32 %v1920_v22, %v389_v42  ;;  %v376_v56 = vadd.f32 %v1918_v19, %v375_v49 }
 0x169   :  { %v334_v7 = vsel %vm333_vm9, %v1548_v18, %v330_v33  ;;  %v345_v41 = vadd.f32 %v1552_v21, %v344_v34  ;;  %vm397_vm9 = vcmp.eq.f32.partialorder %v396_v62, 8.507059e+37 }
 0x16a   :  { %v339_v43 = vsel %vm336_vm10, %v338_v37, %v334_v7  ;;  %v391_v59 = vadd.f32 %v1920_v22, %v390_v54  ;;  %v380_v61 = vsel %vm379_vm4, %v1918_v19, %v376_v56 }
 0x16b   :  { %v349_v47 = vsel %vm348_vm12, %v1552_v21, %v345_v41  ;;  %v408_v48 = vmul.f32 %v339_v43, %v307_v31  ;;  %v385_v11 = vsel %vm382_vm8, %v384_v2, %v380_v61 }
 0x16c   :  { %v354_v50 = vsel %vm351_vm13, %v353_v44, %v349_v47  ;;  %v395_v8 = vsel %vm394_vm7, %v1920_v22, %v391_v59 }
 0x16d   :  { %v409_v52 = vmul.f32 %v405_v46, %v354_v50  ;;  %v410_v53 = vadd.f32 %v408_v48, %v402_v45  ;;  %v400_v15 = vsel %vm397_vm9, %v399_v12, %v395_v8 }
 0x16f   :  { %v411_v55 = vadd.f32 %v409_v52, %v403_v51  ;;  %1555 = vtanh.f32 %v410_v53 }
 0x171   :  { %1557 = vtanh.f32 %v411_v55 }
 0x175   :  { %v1556_v63 = vpop.eup %1555 }
 0x176   :  { %v414_v9 = vsub.f32 %v1872_v39, %v1556_v63 }
 0x177   :  { %v1558_v10 = vpop.eup %1557 }
 0x178   :  { %v415_v13 = vsub.f32 %v1874_v40, %v1558_v10  ;;  %v416_v14 = vmul.f32 %v414_v9, %v385_v11 }
 0x17a   :  { %v417_v17 = vmul.f32 %v415_v13, %v400_v15  ;;  %v1949_v18 = vadd.f32 %v1556_v63, %v416_v14 }
 0x17c   :  { %v1951_v16 = vadd.f32 %v1558_v10, %v417_v17  ;;  %420 = vst.msk [vmem:[%s2412_s8 + $0x1] sm:$0x1] %vm256_vm5, %v1949_v18  ;;  %v422_v39 = vpack.c.bf16 %v1949_v18, %v1949_v18 }
 0x17e   :  { %421 = vst.msk [vmem:[%s2412_s8 + $0x9] sm:$0x1] %vm256_vm5, %v1951_v16  ;;  %v423_v40 = vpack.c.bf16 %v1951_v16, %v1951_v16  ;;  %v426_v20 = vunpack.c.l.b16 %v422_v39 }
 0x180   :  { %v427_v19 = vunpack.c.l.b16 %v423_v40 }
 0x182   :  { %v428_v21 = vrot.slane %v427_v19, 7 }
 0x184   :  { %v429_v22 = vsel %vm244_vm15, %v428_v21, %v426_v20  ;;  %v565_v21 = vld [vmem:[%s2406_s2 + $0x2] sm:$0x1] }
 0x185   :  { %v430_v23 = vpack.c.b16 %v429_v22, %v429_v22 }
 0x187   :  { %1469 = vmatmul.msk.bf16.vlgmr.msrb.gmra.mxu2 %vm67_vm1, %v430_v23  ;;  %1470 = vmatmul.msk.bf16.vlgmr.msrb.gmra.mxu3 %vm67_vm1, %v430_v23 }
 0x188   :  { %1471 = vmatmul.msk.bf16.vlgmr.msra.gmra.mxu0 %vm67_vm1, %v430_v23  ;;  %792 = vmatpush.bf16.msrb.mxu2 %v1779_v3 }
 0x189   :  { %929 = vmatpush.bf16.msrb.mxu3 %v1766_v0  ;;  %942 = vmatpush.bf16.msra.mxu0 %v1771_v1 }
 0x18c   :  { %793 = vmatpush.bf16.msrb.mxu2 %v1798_v6 }
 0x18d   :  { %930 = vmatpush.bf16.msrb.mxu3 %v1785_v4  ;;  %943 = vmatpush.bf16.msra.mxu0 %v1792_v5 }
 0x205   :  { %v469_v24 = vpop.f32.mrf.mxu0 }
 0x206   :  { %v470_v9 = vadd.f32 %v1846_v38, %v469_v24 }
 0x208   :  { %v568_v23 = vrot.slane %v470_v9, 1 }
 0x20a   :  { %v443_v27 = vpop.f32.mrf.mxu2  ;;  %v456_v29 = vpop.f32.mrf.mxu3 }
 0x20b   :  { %v476_v31 = vrot.slane %v443_v27, 1  ;;  %v479_v32 = vadd.f32 %v473_v25, %v443_v27  ;;  %v522_v33 = vrot.slane %v456_v29, 1  ;;  %v525_v34 = vadd.f32 %v519_v26, %v456_v29  ;;  %v566_v27 = vld [vmem:[%s2406_s2 + $0xa] sm:$0x1] }
 0x20d   :  { %v480_v35 = vadd.f32 %v476_v31, %v474_v28  ;;  %v1472_v36 = vmul.f32 -1.442695, %v479_v32  ;;  %v526_v37 = vadd.f32 %v522_v33, %v520_v30  ;;  %v1474_v7 = vmul.f32 -1.442695, %v525_v34  ;;  %v471_v41 = vpop.f32.mrf.mxu0 }
 0x20f   :  { %1559 = vpow2.f32 %v1472_v36  ;;  %v1473_v42 = vmul.f32 -1.442695, %v480_v35  ;;  %v1475_v43 = vmul.f32 -1.442695, %v526_v37 }
 0x210   :  { %1561 = vpow2.f32 %v1474_v7 }
 0x211   :  { %1563 = vpow2.f32 %v1473_v42 }
 0x212   :  { %1565 = vpow2.f32 %v1475_v43  ;;  %v445_v44 = vpop.f32.mrf.mxu2  ;;  %v458_v45 = vpop.f32.mrf.mxu3 }
 0x215   :  { %v1560_v46 = vpop.eup %1559 }
 0x216   :  { %v1562_v47 = vpop.eup %1561  ;;  %v487_v48 = vadd.f32 1.0, %v1560_v46 }
 0x217   :  { %v1564_v49 = vpop.eup %1563  ;;  %v1989_v50 = vadd.f32 1.0, %v1562_v47 }
 0x218   :  { %v1566_v51 = vpop.eup %1565  ;;  %v488_v52 = vadd.f32 1.0, %v1564_v49  ;;  %1567 = vrcp.f32 %v487_v48  ;;  %v500_v61 = vand.u32 2147483648, %v487_v48  ;;  %v498_v2 = vand.u32 2147483647, %v487_v48 }
 0x219   :  { %v1991_v53 = vadd.f32 1.0, %v1566_v51  ;;  %1569 = vrcp.f32 %v1989_v50  ;;  %vm494_vm11 = vweird.f32 %v487_v48  ;;  %v546_v34 = vand.u32 2147483648, %v1989_v50 }
 0x21a   :  { %1571 = vrcp.f32 %v488_v52  ;;  %v515_v10 = vand.u32 2147483648, %v488_v52  ;;  %v513_v14 = vand.u32 2147483647, %v488_v52  ;;  %v501_v15 = vor.u32 1.1754944e-38, %v500_v61 }
 0x21b   :  { %1573 = vrcp.f32 %v1991_v53  ;;  %vm499_vm14 = vcmp.eq.f32.partialorder %v498_v2, 8.507059e+37  ;;  %vm509_vm2 = vweird.f32 %v488_v52  ;;  %vm540_vm7 = vweird.f32 %v1989_v50 }
 0x21c   :  { %v516_v20 = vor.u32 1.1754944e-38, %v515_v10  ;;  %vm514_vm4 = vcmp.eq.f32.partialorder %v513_v14, 8.507059e+37  ;;  %v544_v35 = vand.u32 2147483647, %v1989_v50  ;;  %v561_v37 = vand.u32 2147483648, %v1991_v53 }
 0x21d   :  { %v559_v41 = vand.u32 2147483647, %v1991_v53  ;;  %v547_v43 = vor.u32 1.1754944e-38, %v546_v34 }
 0x21e   :  { %v1568_v54 = vpop.eup %1567 }
 0x21f   :  { %v1995_v55 = vpop.eup %1569  ;;  %v490_v56 = vmul.f32 %v1568_v54, %v487_v48  ;;  %vm495_vm10 = vweird.f32 %v1568_v54  ;;  %v562_v48 = vor.u32 1.1754944e-38, %v561_v37 }
 0x220   :  { %v1572_v57 = vpop.eup %1571  ;;  %v536_v62 = vmul.f32 %v1995_v55, %v1989_v50  ;;  %vm496_vm13 = vmor %vm494_vm11, %vm495_vm10  ;;  %vm541_vm6 = vweird.f32 %v1995_v55  ;;  %vm555_vm10 = vweird.f32 %v1991_v53 }
 0x221   :  { %v491_v58 = vsub.f32 1.0, %v490_v56  ;;  %v505_v59 = vmul.f32 %v1572_v57, %v488_v52  ;;  %v1997_v60 = vpop.eup %1573  ;;  %vm510_vm12 = vweird.f32 %v1572_v57  ;;  %vm542_vm9 = vmor %vm540_vm7, %vm541_vm6 }
 0x222   :  { %v551_v11 = vmul.f32 %v1997_v60, %v1991_v53  ;;  %v537_v17 = vsub.f32 1.0, %v536_v62  ;;  %vm511_vm3 = vmor %vm509_vm2, %vm510_vm12  ;;  %vm556_vm8 = vweird.f32 %v1997_v60  ;;  %vm545_vm12 = vcmp.eq.f32.partialorder %v544_v35, 8.507059e+37  ;;  %v637_v62 = vld [vmem:[%s2404_s0 + $0xb] sm:$0x1] }
 0x223   :  { %v492_v63 = vmul.f32 %v1568_v54, %v491_v58  ;;  %v506_v8 = vsub.f32 1.0, %v505_v59  ;;  %vm557_vm11 = vmor %vm555_vm10, %vm556_vm8 }
 0x224   :  { %v552_v22 = vsub.f32 1.0, %v551_v11  ;;  %v538_v28 = vmul.f32 %v1995_v55, %v537_v17 }
 0x225   :  { %v493_v12 = vadd.f32 %v1568_v54, %v492_v63  ;;  %v507_v13 = vmul.f32 %v1572_v57, %v506_v8 }
 0x226   :  { %v553_v31 = vmul.f32 %v1997_v60, %v552_v22  ;;  %v539_v33 = vadd.f32 %v1995_v55, %v538_v28 }
 0x227   :  { %v497_v39 = vsel %vm496_vm13, %v1568_v54, %v493_v12  ;;  %v508_v40 = vadd.f32 %v1572_v57, %v507_v13  ;;  %vm560_vm13 = vcmp.eq.f32.partialorder %v559_v41, 8.507059e+37 }
 0x228   :  { %v502_v19 = vsel %vm499_vm14, %v501_v15, %v497_v39  ;;  %v554_v36 = vadd.f32 %v1997_v60, %v553_v31  ;;  %v543_v7 = vsel %vm542_vm9, %v1995_v55, %v539_v33 }
 0x229   :  { %v512_v24 = vsel %vm511_vm3, %v1572_v57, %v508_v40  ;;  %v571_v25 = vmul.f32 %v502_v19, %v470_v9  ;;  %v548_v47 = vsel %vm545_vm12, %v547_v43, %v543_v7 }
 0x22a   :  { %v517_v26 = vsel %vm514_vm4, %v516_v20, %v512_v24  ;;  %v558_v44 = vsel %vm557_vm11, %v1997_v60, %v554_v36  ;;  %v636_v60 = vld [vmem:[%s2404_s0 + $0x3] sm:$0x1] }
 0x22b   :  { %v572_v29 = vmul.f32 %v568_v23, %v517_v26  ;;  %v573_v30 = vadd.f32 %v571_v25, %v565_v21  ;;  %v563_v51 = vsel %vm560_vm13, %v562_v48, %v558_v44 }
 0x22d   :  { %v574_v32 = vadd.f32 %v572_v29, %v566_v27  ;;  %1575 = vtanh.f32 %v573_v30 }
 0x22f   :  { %1577 = vtanh.f32 %v574_v32 }
 0x233   :  { %v1576_v42 = vpop.eup %1575 }
 0x234   :  { %v577_v45 = vsub.f32 %v1949_v18, %v1576_v42 }
 0x235   :  { %v1578_v46 = vpop.eup %1577 }
 0x236   :  { %v578_v49 = vsub.f32 %v1951_v16, %v1578_v46  ;;  %v579_v50 = vmul.f32 %v577_v45, %v548_v47 }
 0x238   :  { %v580_v52 = vmul.f32 %v578_v49, %v563_v51  ;;  %v2026_v54 = vadd.f32 %v1576_v42, %v579_v50  ;;  %v728_v50 = vld [vmem:[%s2406_s2 + $0x3] sm:$0x1] }
 0x23a   :  { %v2028_v53 = vadd.f32 %v1578_v46, %v580_v52  ;;  %583 = vst.msk [vmem:[%s2412_s8 + $0x2] sm:$0x1] %vm256_vm5, %v2026_v54  ;;  %v585_v18 = vpack.c.bf16 %v2026_v54, %v2026_v54 }
 0x23c   :  { %584 = vst.msk [vmem:[%s2412_s8 + $0xa] sm:$0x1] %vm256_vm5, %v2028_v53  ;;  %v586_v16 = vpack.c.bf16 %v2028_v53, %v2028_v53  ;;  %v589_v56 = vunpack.c.l.b16 %v585_v18 }
 0x23e   :  { %v590_v55 = vunpack.c.l.b16 %v586_v16 }
 0x240   :  { %v591_v57 = vrot.slane %v590_v55, 7 }
 0x242   :  { %v592_v58 = vsel %vm244_vm15, %v591_v57, %v589_v56  ;;  %v729_v57 = vld [vmem:[%s2406_s2 + $0xb] sm:$0x1] }
 0x243   :  { %v593_v59 = vpack.c.b16 %v592_v58, %v592_v58 }
 0x245   :  { %1476 = vmatmul.msk.bf16.vlgmr.msra.gmra.mxu1 %vm67_vm1, %v593_v59  ;;  %1477 = vmatmul.msk.bf16.vlgmr.msra.gmra.mxu2 %vm67_vm1, %v593_v59 }
 0x246   :  { %1478 = vmatmul.msk.bf16.vlgmr.msra.gmra.mxu3 %vm67_vm1, %v593_v59  ;;  %955 = vmatpush.bf16.msra.mxu1 %v1779_v3 }
 0x247   :  { %1092 = vmatpush.bf16.msra.mxu2 %v1766_v0  ;;  %1105 = vmatpush.bf16.msra.mxu3 %v1771_v1  ;;  %v682_v1 = vld [vmem:[%s2405_s1 + $0x3] sm:$0x1] }
 0x24a   :  { %956 = vmatpush.bf16.msra.mxu1 %v1798_v6  ;;  %v683_v6 = vld [vmem:[%s2405_s1 + $0xb] sm:$0x1] }
 0x24b   :  { %1093 = vmatpush.bf16.msra.mxu2 %v1785_v4  ;;  %1106 = vmatpush.bf16.msra.mxu3 %v1792_v5 }
 0x2c2   :  { %v606_v61 = vpop.f32.mrf.mxu1 }
 0x2c3   :  { %v639_v3 = vrot.slane %v606_v61, 1  ;;  %v642_v63 = vadd.f32 %v636_v60, %v606_v61 }
 0x2c5   :  { %v643_v0 = vadd.f32 %v639_v3, %v637_v62  ;;  %v1479_v2 = vmul.f32 -1.442695, %v642_v63 }
 0x2c7   :  { %1579 = vpow2.f32 %v1479_v2  ;;  %v1480_v4 = vmul.f32 -1.442695, %v643_v0 }
 0x2c8   :  { %v619_v5 = vpop.f32.mrf.mxu2 }
 0x2c9   :  { %1581 = vpow2.f32 %v1480_v4  ;;  %v685_v8 = vrot.slane %v619_v5, 1  ;;  %v688_v9 = vadd.f32 %v682_v1, %v619_v5  ;;  %v632_v10 = vpop.f32.mrf.mxu3 }
 0x2ca   :  { %v608_v11 = vpop.f32.mrf.mxu1  ;;  %v633_v42 = vadd.f32 %v1846_v38, %v632_v10 }
 0x2cb   :  { %v689_v12 = vadd.f32 %v685_v8, %v683_v6  ;;  %v1481_v13 = vmul.f32 -1.442695, %v688_v9 }
 0x2cc   :  { %v731_v55 = vrot.slane %v633_v42, 1 }
 0x2cd   :  { %v1580_v14 = vpop.eup %1579  ;;  %1583 = vpow2.f32 %v1481_v13  ;;  %v1482_v15 = vmul.f32 -1.442695, %v689_v12 }
 0x2ce   :  { %v650_v17 = vadd.f32 1.0, %v1580_v14 }
 0x2cf   :  { %v1582_v39 = vpop.eup %1581  ;;  %1585 = vpow2.f32 %v1482_v15 }
 0x2d0   :  { %v651_v40 = vadd.f32 1.0, %v1582_v39  ;;  %1587 = vrcp.f32 %v650_v17  ;;  %v621_v19 = vpop.f32.mrf.mxu2  ;;  %v663_v30 = vand.u32 2147483648, %v650_v17  ;;  %v661_v32 = vand.u32 2147483647, %v650_v17 }
 0x2d1   :  { %v634_v20 = vpop.f32.mrf.mxu3  ;;  %vm657_vm2 = vweird.f32 %v650_v17 }
 0x2d2   :  { %1589 = vrcp.f32 %v651_v40  ;;  %v678_v7 = vand.u32 2147483648, %v651_v40  ;;  %v664_v43 = vor.u32 1.1754944e-38, %v663_v30  ;;  %v676_v44 = vand.u32 2147483647, %v651_v40  ;;  %v799_v30 = vld [vmem:[%s2404_s0 + $0x4] sm:$0x1] }
 0x2d3   :  { %v1584_v21 = vpop.eup %1583  ;;  %vm662_vm6 = vcmp.eq.f32.partialorder %v661_v32, 8.507059e+37  ;;  %vm672_vm7 = vweird.f32 %v651_v40 }
 0x2d4   :  { %v2066_v22 = vadd.f32 1.0, %v1584_v21  ;;  %v679_v52 = vor.u32 1.1754944e-38, %v678_v7  ;;  %vm677_vm9 = vcmp.eq.f32.partialorder %v676_v44, 8.507059e+37 }
 0x2d5   :  { %v1586_v23 = vpop.eup %1585 }
 0x2d6   :  { %v1588_v24 = vpop.eup %1587  ;;  %v2068_v25 = vadd.f32 1.0, %v1586_v23  ;;  %1591 = vrcp.f32 %v2066_v22  ;;  %v709_v3 = vand.u32 2147483648, %v2066_v22  ;;  %vm703_vm11 = vweird.f32 %v2066_v22 }
 0x2d7   :  { %v653_v26 = vmul.f32 %v1588_v24, %v650_v17  ;;  %vm658_vm14 = vweird.f32 %v1588_v24  ;;  %v707_v63 = vand.u32 2147483647, %v2066_v22 }
 0x2d8   :  { %v1590_v27 = vpop.eup %1589  ;;  %1593 = vrcp.f32 %v2068_v25  ;;  %vm659_vm3 = vmor %vm657_vm2, %vm658_vm14  ;;  %v724_v2 = vand.u32 2147483648, %v2068_v25  ;;  %v710_v5 = vor.u32 1.1754944e-38, %v709_v3  ;;  %vm718_vm14 = vweird.f32 %v2068_v25 }
 0x2d9   :  { %v654_v28 = vsub.f32 1.0, %v653_v26  ;;  %v668_v29 = vmul.f32 %v1590_v27, %v651_v40  ;;  %vm673_vm4 = vweird.f32 %v1590_v27  ;;  %v722_v6 = vand.u32 2147483647, %v2068_v25  ;;  %v1681_v26 = vld [vmem:[%s2409_s5 + $0x8] sm:$0xff] }
 0x2da   :  { %vm674_vm8 = vmor %vm672_vm7, %vm673_vm4  ;;  %v725_v12 = vor.u32 1.1754944e-38, %v724_v2 }
 0x2db   :  { %v655_v31 = vmul.f32 %v1588_v24, %v654_v28  ;;  %v669_v33 = vsub.f32 1.0, %v668_v29  ;;  %vm723_vm4 = vcmp.eq.f32.partialorder %v722_v6, 8.507059e+37  ;;  %v1683_v28 = vld [vmem:[%s2408_s4] sm:$0xff] }
 0x2dc   :  { %v1592_v34 = vpop.eup %1591  ;;  %v1684_v29 = vld [vmem:[%s2409_s5] sm:$0xff] }
 0x2dd   :  { %v699_v35 = vmul.f32 %v1592_v34, %v2066_v22  ;;  %v656_v36 = vadd.f32 %v1588_v24, %v655_v31  ;;  %v670_v37 = vmul.f32 %v1590_v27, %v669_v33  ;;  %vm704_vm10 = vweird.f32 %v1592_v34  ;;  %v845_v31 = vld [vmem:[%s2405_s1 + $0x4] sm:$0x1]  ;;  %v800_v33 = vld [vmem:[%s2404_s0 + $0xc] sm:$0x1] }
 0x2de   :  { %v1594_v41 = vpop.eup %1593  ;;  %vm705_vm12 = vmor %vm703_vm11, %vm704_vm10 }
 0x2df   :  { %v700_v45 = vsub.f32 1.0, %v699_v35  ;;  %v714_v46 = vmul.f32 %v1594_v41, %v2068_v25  ;;  %v660_v47 = vsel %vm659_vm3, %v1588_v24, %v656_v36  ;;  %v671_v49 = vadd.f32 %v1590_v27, %v670_v37  ;;  %v2114_v24 = vld [vmem:[%s2410_s6 + $0x8] sm:$0xff] }
 0x2e0   :  { %v665_v48 = vsel %vm662_vm6, %v664_v43, %v660_v47  ;;  %vm719_vm13 = vweird.f32 %v1594_v41  ;;  %vm708_vm3 = vcmp.eq.f32.partialorder %v707_v63, 8.507059e+37  ;;  %v1680_v25 = vld [vmem:[%s2408_s4 + $0x8] sm:$0xff] }
 0x2e1   :  { %v715_v51 = vsub.f32 1.0, %v714_v46  ;;  %v734_v38 = vmul.f32 %v665_v48, %v633_v42  ;;  %v701_v18 = vmul.f32 %v1592_v34, %v700_v45  ;;  %v675_v16 = vsel %vm674_vm8, %v1590_v27, %v671_v49  ;;  %vm720_vm2 = vmor %vm718_vm14, %vm719_vm13  ;;  %v2126_v27 = vld [vmem:[%s2410_s6] sm:$0xff]  ;;  %v846_v35 = vld [vmem:[%s2405_s1 + $0xc] sm:$0x1] }
 0x2e2   :  { %v680_v56 = vsel %vm677_vm9, %v679_v52, %v675_v16 }
 0x2e3   :  { %v736_v58 = vadd.f32 %v734_v38, %v728_v50  ;;  %v735_v59 = vmul.f32 %v731_v55, %v680_v56  ;;  %v716_v60 = vmul.f32 %v1594_v41, %v715_v51  ;;  %v702_v61 = vadd.f32 %v1592_v34, %v701_v18 }
 0x2e5   :  { %1595 = vtanh.f32 %v736_v58  ;;  %v737_v62 = vadd.f32 %v735_v59, %v729_v57  ;;  %v717_v0 = vadd.f32 %v1594_v41, %v716_v60  ;;  %v706_v1 = vsel %vm705_vm12, %v1592_v34, %v702_v61 }
 0x2e6   :  { %v711_v9 = vsel %vm708_vm3, %v710_v5, %v706_v1 }
 0x2e7   :  { %1597 = vtanh.f32 %v737_v62  ;;  %v721_v10 = vsel %vm720_vm2, %v1594_v41, %v717_v0 }
 0x2e8   :  { %v726_v15 = vsel %vm723_vm4, %v725_v12, %v721_v10 }
 0x2eb   :  { %v1596_v4 = vpop.eup %1595 }
 0x2ec   :  { %v740_v8 = vsub.f32 %v2026_v54, %v1596_v4 }
 0x2ed   :  { %v1598_v11 = vpop.eup %1597 }
 0x2ee   :  { %v742_v13 = vmul.f32 %v740_v8, %v711_v9  ;;  %v741_v14 = vsub.f32 %v2028_v53, %v1598_v11  ;;  %v2164_v9 = vld [vmem:[%s2411_s7] ss:$0 sm:$0xff]  ;;  %s1418_s7 = sshll.u32 %s1712_s19, 4  ;;  %s1419_s7 = int_to_ptr.vmem [resolvable:$true] %s1418_s7 }
 0x2f0   :  { %v2089_v17 = vadd.f32 %v1596_v4, %v742_v13  ;;  %v743_v39 = vmul.f32 %v741_v14, %v726_v15 }
 0x2f2   :  { %746 = vst.msk [vmem:[%s2412_s8 + $0x3] sm:$0x1] %vm256_vm5, %v2089_v17  ;;  %v2096_v40 = vadd.f32 %v1598_v11, %v743_v39  ;;  %v748_v54 = vpack.c.bf16 %v2089_v17, %v2089_v17 }
 0x2f4   :  { %747 = vst.msk [vmem:[%s2412_s8 + $0xb] sm:$0x1] %vm256_vm5, %v2096_v40  ;;  %v749_v53 = vpack.c.bf16 %v2096_v40, %v2096_v40  ;;  %v752_v20 = vunpack.c.l.b16 %v748_v54 }
 0x2f6   :  { %v753_v19 = vunpack.c.l.b16 %v749_v53 }
 0x2f8   :  { %v754_v21 = vrot.slane %v753_v19, 7 }
 0x2fa   :  { %v755_v22 = vsel %vm244_vm15, %v754_v21, %v752_v20 }
 0x2fb   :  { %v756_v23 = vpack.c.b16 %v755_v22, %v755_v22  ;;  %v891_v22 = vld [vmem:[%s2406_s2 + $0x4] sm:$0x1] }
 0x2fd   :  { %1483 = vmatmul.msk.bf16.vlgmr.msrb.gmra.mxu0 %vm67_vm1, %v756_v23  ;;  %1484 = vmatmul.msk.bf16.vlgmr.msrb.gmra.mxu1 %vm67_vm1, %v756_v23 }
 0x2fe   :  { %1485 = vmatmul.msk.bf16.vlgmr.msrb.gmra.mxu2 %vm67_vm1, %v756_v23  ;;  %1118 = vmatpush.bf16.msrb.mxu0 %v2114_v24 }
 0x2ff   :  { %1255 = vmatpush.bf16.msrb.mxu1 %v1680_v25  ;;  %1268 = vmatpush.bf16.msrb.mxu2 %v1681_v26 }
 0x302   :  { %1119 = vmatpush.bf16.msrb.mxu0 %v2126_v27 }
 0x303   :  { %1256 = vmatpush.bf16.msrb.mxu1 %v1683_v28  ;;  %1269 = vmatpush.bf16.msrb.mxu2 %v1684_v29 }
 0x37a   :  { %v769_v32 = vpop.f32.mrf.mxu0  ;;  %v782_v34 = vpop.f32.mrf.mxu1 }
 0x37b   :  { %v802_v36 = vrot.slane %v769_v32, 1  ;;  %v805_v37 = vadd.f32 %v799_v30, %v769_v32  ;;  %v848_v7 = vrot.slane %v782_v34, 1  ;;  %v851_v41 = vadd.f32 %v845_v31, %v782_v34  ;;  %v892_v30 = vld [vmem:[%s2406_s2 + $0xc] sm:$0x1] }
 0x37d   :  { %v806_v42 = vadd.f32 %v802_v36, %v800_v33  ;;  %v1486_v43 = vmul.f32 -1.442695, %v805_v37  ;;  %v852_v44 = vadd.f32 %v848_v7, %v846_v35  ;;  %v1488_v45 = vmul.f32 -1.442695, %v851_v41 }
 0x37f   :  { %1599 = vpow2.f32 %v1486_v43  ;;  %v1487_v46 = vmul.f32 -1.442695, %v806_v42  ;;  %v1489_v47 = vmul.f32 -1.442695, %v852_v44 }
 0x380   :  { %1601 = vpow2.f32 %v1488_v45 }
 0x381   :  { %1603 = vpow2.f32 %v1487_v46  ;;  %v795_v48 = vpop.f32.mrf.mxu2 }
 0x382   :  { %1605 = vpow2.f32 %v1489_v47  ;;  %v771_v49 = vpop.f32.mrf.mxu0  ;;  %v784_v50 = vpop.f32.mrf.mxu1  ;;  %v796_v10 = vadd.f32 %v2164_v9, %v795_v48 }
 0x384   :  { %v894_v25 = vrot.slane %v796_v10, 1 }
 0x385   :  { %v1600_v51 = vpop.eup %1599 }
 0x386   :  { %v1602_v52 = vpop.eup %1601  ;;  %v813_v38 = vadd.f32 1.0, %v1600_v51 }
 0x387   :  { %v1604_v18 = vpop.eup %1603  ;;  %v2147_v16 = vadd.f32 1.0, %v1602_v52 }
 0x388   :  { %v1606_v55 = vpop.eup %1605  ;;  %v814_v56 = vadd.f32 1.0, %v1604_v18  ;;  %1607 = vrcp.f32 %v813_v38  ;;  %v826_v1 = vand.u32 2147483648, %v813_v38  ;;  %v824_v5 = vand.u32 2147483647, %v813_v38 }
 0x389   :  { %v2149_v57 = vadd.f32 1.0, %v1606_v55  ;;  %1609 = vrcp.f32 %v2147_v16  ;;  %v797_v58 = vpop.f32.mrf.mxu2  ;;  %vm820_vm7 = vweird.f32 %v813_v38  ;;  %v872_v36 = vand.u32 2147483648, %v2147_v16 }
 0x38a   :  { %1611 = vrcp.f32 %v814_v56  ;;  %v841_v11 = vand.u32 2147483648, %v814_v56  ;;  %v839_v14 = vand.u32 2147483647, %v814_v56  ;;  %v827_v39 = vor.u32 1.1754944e-38, %v826_v1 }
 0x38b   :  { %1613 = vrcp.f32 %v2149_v57  ;;  %vm825_vm10 = vcmp.eq.f32.partialorder %v824_v5, 8.507059e+37  ;;  %vm835_vm11 = vweird.f32 %v814_v56  ;;  %vm866_vm2 = vweird.f32 %v2147_v16 }
 0x38c   :  { %v842_v21 = vor.u32 1.1754944e-38, %v841_v11  ;;  %vm840_vm13 = vcmp.eq.f32.partialorder %v839_v14, 8.507059e+37  ;;  %v870_v37 = vand.u32 2147483647, %v2147_v16  ;;  %v887_v41 = vand.u32 2147483648, %v2149_v57 }
 0x38d   :  { %v885_v42 = vand.u32 2147483647, %v2149_v57  ;;  %v873_v45 = vor.u32 1.1754944e-38, %v872_v36 }
 0x38e   :  { %v1608_v59 = vpop.eup %1607  ;;  %v888_v49 = vor.u32 1.1754944e-38, %v887_v41 }
 0x38f   :  { %v2153_v60 = vpop.eup %1609  ;;  %v816_v61 = vmul.f32 %v1608_v59, %v813_v38  ;;  %vm821_vm6 = vweird.f32 %v1608_v59 }
 0x390   :  { %v1612_v62 = vpop.eup %1611  ;;  %v862_v2 = vmul.f32 %v2153_v60, %v2147_v16  ;;  %vm822_vm9 = vmor %vm820_vm7, %vm821_vm6  ;;  %vm867_vm14 = vweird.f32 %v2153_v60  ;;  %vm881_vm6 = vweird.f32 %v2149_v57 }
 0x391   :  { %v2155_v3 = vpop.eup %1613  ;;  %v817_v63 = vsub.f32 1.0, %v816_v61  ;;  %v831_v0 = vmul.f32 %v1612_v62, %v814_v56  ;;  %vm836_vm8 = vweird.f32 %v1612_v62  ;;  %vm868_vm4 = vmor %vm866_vm2, %vm867_vm14  ;;  %v1008_v61 = vld [vmem:[%s2405_s1 + $0x5] sm:$0x1] }
 0x392   :  { %v877_v8 = vmul.f32 %v2155_v3, %v2149_v57  ;;  %v863_v15 = vsub.f32 1.0, %v862_v2  ;;  %vm837_vm12 = vmor %vm835_vm11, %vm836_vm8  ;;  %vm882_vm3 = vweird.f32 %v2155_v3  ;;  %vm871_vm8 = vcmp.eq.f32.partialorder %v870_v37, 8.507059e+37 }
 0x393   :  { %v818_v4 = vmul.f32 %v1608_v59, %v817_v63  ;;  %v832_v6 = vsub.f32 1.0, %v831_v0  ;;  %vm883_vm7 = vmor %vm881_vm6, %vm882_vm3 }
 0x394   :  { %v878_v19 = vsub.f32 1.0, %v877_v8  ;;  %v864_v28 = vmul.f32 %v2153_v60, %v863_v15 }
 0x395   :  { %v819_v12 = vadd.f32 %v1608_v59, %v818_v4  ;;  %v833_v13 = vmul.f32 %v1612_v62, %v832_v6  ;;  %v963_v6 = vld [vmem:[%s2404_s0 + $0xd] sm:$0x1] }
 0x396   :  { %v879_v33 = vmul.f32 %v2155_v3, %v878_v19  ;;  %v865_v35 = vadd.f32 %v2153_v60, %v864_v28 }
 0x397   :  { %v823_v54 = vsel %vm822_vm9, %v1608_v59, %v819_v12  ;;  %v834_v53 = vadd.f32 %v1612_v62, %v833_v13  ;;  %vm886_vm9 = vcmp.eq.f32.partialorder %v885_v42, 8.507059e+37 }
 0x398   :  { %v828_v20 = vsel %vm825_vm10, %v827_v39, %v823_v54  ;;  %v880_v7 = vadd.f32 %v2155_v3, %v879_v33  ;;  %v869_v43 = vsel %vm868_vm4, %v2153_v60, %v865_v35 }
 0x399   :  { %v838_v23 = vsel %vm837_vm12, %v1612_v62, %v834_v53  ;;  %v897_v26 = vmul.f32 %v828_v20, %v796_v10  ;;  %v874_v50 = vsel %vm871_vm8, %v873_v45, %v869_v43 }
 0x39a   :  { %v843_v29 = vsel %vm840_vm13, %v842_v21, %v838_v23  ;;  %v884_v46 = vsel %vm883_vm7, %v2155_v3, %v880_v7  ;;  %v1009_v3 = vld [vmem:[%s2405_s1 + $0xd] sm:$0x1] }
 0x39b   :  { %v898_v31 = vmul.f32 %v894_v25, %v843_v29  ;;  %v899_v32 = vadd.f32 %v897_v26, %v891_v22  ;;  %v889_v38 = vsel %vm886_vm9, %v888_v49, %v884_v46 }
 0x39d   :  { %v900_v34 = vadd.f32 %v898_v31, %v892_v30  ;;  %1615 = vtanh.f32 %v899_v32 }
 0x39f   :  { %1617 = vtanh.f32 %v900_v34 }
 0x3a3   :  { %v1616_v44 = vpop.eup %1615 }
 0x3a4   :  { %v903_v47 = vsub.f32 %v2089_v17, %v1616_v44 }
 0x3a5   :  { %v1618_v48 = vpop.eup %1617 }
 0x3a6   :  { %v904_v51 = vsub.f32 %v2096_v40, %v1618_v48  ;;  %v905_v52 = vmul.f32 %v903_v47, %v874_v50 }
 0x3a8   :  { %v906_v18 = vmul.f32 %v904_v51, %v889_v38  ;;  %v2189_v16 = vadd.f32 %v1616_v44, %v905_v52 }
 0x3aa   :  { %v2191_v55 = vadd.f32 %v1618_v48, %v906_v18  ;;  %909 = vst.msk [vmem:[%s2412_s8 + $0x4] sm:$0x1] %vm256_vm5, %v2189_v16  ;;  %v911_v17 = vpack.c.bf16 %v2189_v16, %v2189_v16  ;;  %v1054_v18 = vld [vmem:[%s2406_s2 + $0x5] sm:$0x1] }
 0x3ac   :  { %910 = vst.msk [vmem:[%s2412_s8 + $0xc] sm:$0x1] %vm256_vm5, %v2191_v55  ;;  %v912_v40 = vpack.c.bf16 %v2191_v55, %v2191_v55  ;;  %v915_v57 = vunpack.c.l.b16 %v911_v17 }
 0x3ae   :  { %v916_v56 = vunpack.c.l.b16 %v912_v40 }
 0x3b0   :  { %v917_v58 = vrot.slane %v916_v56, 7 }
 0x3b2   :  { %v918_v59 = vsel %vm244_vm15, %v917_v58, %v915_v57 }
 0x3b3   :  { %v919_v60 = vpack.c.b16 %v918_v59, %v918_v59  ;;  %v1055_v59 = vld [vmem:[%s2406_s2 + $0xd] sm:$0x1] }
 0x3b5   :  { %1490 = vmatmul.msk.bf16.vlgmr.msrb.gmra.mxu3 %vm67_vm1, %v919_v60  ;;  %1491 = vmatmul.msk.bf16.vlgmr.msra.gmra.mxu0 %vm67_vm1, %v919_v60 }
 0x3b6   :  { %1492 = vmatmul.msk.bf16.vlgmr.msra.gmra.mxu1 %vm67_vm1, %v919_v60  ;;  %1281 = vmatpush.bf16.msrb.mxu3 %v2114_v24  ;;  %v962_v24 = vld [vmem:[%s2404_s0 + $0x5] sm:$0x1] }
 0x3ba   :  { %1282 = vmatpush.bf16.msrb.mxu3 %v2126_v27 }
 0x432   :  { %v945_v62 = vpop.f32.mrf.mxu0 }
 0x433   :  { %v1011_v63 = vrot.slane %v945_v62, 1  ;;  %v1014_v0 = vadd.f32 %v1008_v61, %v945_v62  ;;  %v958_v2 = vpop.f32.mrf.mxu1 }
 0x434   :  { %v959_v42 = vadd.f32 %v2164_v9, %v958_v2 }
 0x435   :  { %v1015_v1 = vadd.f32 %v1011_v63, %v1009_v3  ;;  %v1495_v4 = vmul.f32 -1.442695, %v1014_v0 }
 0x436   :  { %v1057_v17 = vrot.slane %v959_v42, 1 }
 0x437   :  { %v1496_v5 = vmul.f32 -1.442695, %v1015_v1  ;;  %1619 = vpow2.f32 %v1495_v4 }
 0x438   :  { %v932_v27 = vpop.f32.mrf.mxu3 }
 0x439   :  { %v965_v8 = vrot.slane %v932_v27, 1  ;;  %v968_v10 = vadd.f32 %v962_v24, %v932_v27  ;;  %1621 = vpow2.f32 %v1496_v5 }
 0x43a   :  { %v947_v11 = vpop.f32.mrf.mxu0 }
 0x43b   :  { %v969_v12 = vadd.f32 %v965_v8, %v963_v6  ;;  %v1493_v13 = vmul.f32 -1.442695, %v968_v10  ;;  %v960_v14 = vpop.f32.mrf.mxu1 }
 0x43d   :  { %1623 = vpow2.f32 %v1493_v13  ;;  %v1494_v15 = vmul.f32 -1.442695, %v969_v12  ;;  %v1620_v39 = vpop.eup %1619 }
 0x43e   :  { %v2225_v20 = vadd.f32 1.0, %v1620_v39 }
 0x43f   :  { %1625 = vpow2.f32 %v1494_v15  ;;  %v1622_v53 = vpop.eup %1621 }
 0x440   :  { %v934_v54 = vpop.f32.mrf.mxu3  ;;  %v2227_v23 = vadd.f32 1.0, %v1622_v53  ;;  %v1035_v0 = vand.u32 2147483648, %v2225_v20  ;;  %vm1029_vm7 = vweird.f32 %v2225_v20  ;;  %v1033_v2 = vand.u32 2147483647, %v2225_v20 }
 0x442   :  { %v1050_v4 = vand.u32 2147483648, %v2227_v23  ;;  %v1048_v5 = vand.u32 2147483647, %v2227_v23  ;;  %v1036_v6 = vor.u32 1.1754944e-38, %v1035_v0 }
 0x443   :  { %v1624_v19 = vpop.eup %1623 }
 0x444   :  { %v976_v21 = vadd.f32 1.0, %v1624_v19  ;;  %v1051_v13 = vor.u32 1.1754944e-38, %v1050_v4 }
 0x445   :  { %v1626_v22 = vpop.eup %1625 }
 0x446   :  { %v977_v25 = vadd.f32 1.0, %v1626_v22  ;;  %1627 = vrcp.f32 %v976_v21  ;;  %v989_v35 = vand.u32 2147483648, %v976_v21  ;;  %v987_v37 = vand.u32 2147483647, %v976_v21 }
 0x447   :  { %1629 = vrcp.f32 %v2225_v20  ;;  %vm983_vm11 = vweird.f32 %v976_v21 }
 0x448   :  { %1631 = vrcp.f32 %v977_v25  ;;  %v1004_v43 = vand.u32 2147483648, %v977_v25  ;;  %v1002_v46 = vand.u32 2147483647, %v977_v25  ;;  %v990_v48 = vor.u32 1.1754944e-38, %v989_v35 }
 0x449   :  { %1633 = vrcp.f32 %v2227_v23  ;;  %vm988_vm14 = vcmp.eq.f32.partialorder %v987_v37, 8.507059e+37  ;;  %vm998_vm2 = vweird.f32 %v977_v25 }
 0x44a   :  { %v1005_v38 = vor.u32 1.1754944e-38, %v1004_v43  ;;  %vm1003_vm4 = vcmp.eq.f32.partialorder %v1002_v46, 8.507059e+37 }
 0x44c   :  { %v1628_v26 = vpop.eup %1627 }
 0x44d   :  { %v2231_v28 = vpop.eup %1629  ;;  %v979_v29 = vmul.f32 %v1628_v26, %v976_v21  ;;  %vm984_vm10 = vweird.f32 %v1628_v26 }
 0x44e   :  { %v1632_v30 = vpop.eup %1631  ;;  %v1025_v34 = vmul.f32 %v2231_v28, %v2225_v20  ;;  %vm985_vm13 = vmor %vm983_vm11, %vm984_vm10  ;;  %vm1030_vm6 = vweird.f32 %v2231_v28  ;;  %vm1044_vm10 = vweird.f32 %v2227_v23 }
 0x44f   :  { %v2233_v31 = vpop.eup %1633  ;;  %v980_v32 = vsub.f32 1.0, %v979_v29  ;;  %v994_v33 = vmul.f32 %v1632_v30, %v977_v25  ;;  %vm999_vm12 = vweird.f32 %v1632_v30  ;;  %vm1031_vm9 = vmor %vm1029_vm7, %vm1030_vm6  ;;  %v1171_v29 = vld [vmem:[%s2405_s1 + $0x6] sm:$0x1] }
 0x450   :  { %v1040_v41 = vmul.f32 %v2233_v31, %v2227_v23  ;;  %v1026_v47 = vsub.f32 1.0, %v1025_v34  ;;  %vm1000_vm3 = vmor %vm998_vm2, %vm999_vm12  ;;  %vm1045_vm8 = vweird.f32 %v2233_v31  ;;  %vm1034_vm12 = vcmp.eq.f32.partialorder %v1033_v2, 8.507059e+37 }
 0x451   :  { %v981_v36 = vmul.f32 %v1628_v26, %v980_v32  ;;  %v995_v7 = vsub.f32 1.0, %v994_v33  ;;  %vm1046_vm11 = vmor %vm1044_vm10, %vm1045_vm8  ;;  %v1172_v33 = vld [vmem:[%s2405_s1 + $0xe] sm:$0x1] }
 0x452   :  { %v1041_v51 = vsub.f32 1.0, %v1040_v41  ;;  %v1027_v57 = vmul.f32 %v2231_v28, %v1026_v47 }
 0x453   :  { %v982_v44 = vadd.f32 %v1628_v26, %v981_v36  ;;  %v996_v45 = vmul.f32 %v1632_v30, %v995_v7 }
 0x454   :  { %v1042_v62 = vmul.f32 %v2233_v31, %v1041_v51  ;;  %v1028_v63 = vadd.f32 %v2231_v28, %v1027_v57 }
 0x455   :  { %v986_v49 = vsel %vm985_vm13, %v1628_v26, %v982_v44  ;;  %v997_v50 = vadd.f32 %v1632_v30, %v996_v45  ;;  %vm1049_vm13 = vcmp.eq.f32.partialorder %v1048_v5, 8.507059e+37 }
 0x456   :  { %v991_v52 = vsel %vm988_vm14, %v990_v48, %v986_v49  ;;  %v1043_v1 = vadd.f32 %v2233_v31, %v1042_v62  ;;  %v1032_v24 = vsel %vm1031_vm9, %v2231_v28, %v1028_v63  ;;  %v1125_v28 = vld [vmem:[%s2404_s0 + $0x6] sm:$0x1] }
 0x457   :  { %v1001_v40 = vsel %vm1000_vm3, %v1632_v30, %v997_v50  ;;  %v1060_v56 = vmul.f32 %v991_v52, %v959_v42  ;;  %v1037_v12 = vsel %vm1034_vm12, %v1036_v6, %v1032_v24 }
 0x458   :  { %v1006_v58 = vsel %vm1003_vm4, %v1005_v38, %v1001_v40  ;;  %v1047_v8 = vsel %vm1046_vm11, %v2233_v31, %v1043_v1  ;;  %v1126_v31 = vld [vmem:[%s2404_s0 + $0xe] sm:$0x1] }
 0x459   :  { %v1061_v60 = vmul.f32 %v1057_v17, %v1006_v58  ;;  %v1062_v61 = vadd.f32 %v1060_v56, %v1054_v18  ;;  %v1052_v39 = vsel %vm1049_vm13, %v1051_v13, %v1047_v8 }
 0x45b   :  { %v1063_v3 = vadd.f32 %v1061_v60, %v1055_v59  ;;  %1635 = vtanh.f32 %v1062_v61 }
 0x45d   :  { %1637 = vtanh.f32 %v1063_v3 }
 0x461   :  { %v1636_v27 = vpop.eup %1635 }
 0x462   :  { %v1066_v10 = vsub.f32 %v2189_v16, %v1636_v27 }
 0x463   :  { %v1638_v11 = vpop.eup %1637 }
 0x464   :  { %v1067_v14 = vsub.f32 %v2191_v55, %v1638_v11  ;;  %v1068_v15 = vmul.f32 %v1066_v10, %v1037_v12 }
 0x466   :  { %v1069_v54 = vmul.f32 %v1067_v14, %v1052_v39  ;;  %v2262_v53 = vadd.f32 %v1636_v27, %v1068_v15  ;;  %v1217_v39 = vld [vmem:[%s2406_s2 + $0x6] sm:$0x1] }
 0x468   :  { %v2264_v19 = vadd.f32 %v1638_v11, %v1069_v54  ;;  %1072 = vst.msk [vmem:[%s2412_s8 + $0x5] sm:$0x1] %vm256_vm5, %v2262_v53  ;;  %v1074_v16 = vpack.c.bf16 %v2262_v53, %v2262_v53 }
 0x46a   :  { %1073 = vst.msk [vmem:[%s2412_s8 + $0xd] sm:$0x1] %vm256_vm5, %v2264_v19  ;;  %v1075_v55 = vpack.c.bf16 %v2264_v19, %v2264_v19  ;;  %v1078_v21 = vunpack.c.l.b16 %v1074_v16 }
 0x46c   :  { %v1079_v20 = vunpack.c.l.b16 %v1075_v55 }
 0x46e   :  { %v1080_v22 = vrot.slane %v1079_v20, 7 }
 0x470   :  { %v1081_v23 = vsel %vm244_vm15, %v1080_v22, %v1078_v21  ;;  %v1218_v22 = vld [vmem:[%s2406_s2 + $0xe] sm:$0x1] }
 0x471   :  { %v1082_v25 = vpack.c.b16 %v1081_v23, %v1081_v23 }
 0x473   :  { %1497 = vmatmul.msk.bf16.vlgmr.msra.gmra.mxu2 %vm67_vm1, %v1082_v25  ;;  %1498 = vmatmul.msk.bf16.vlgmr.msra.gmra.mxu3 %vm67_vm1, %v1082_v25 }
 0x474   :  { %1499 = vmatmul.msk.bf16.vlgmr.msrb.gmra.mxu0 %vm67_vm1, %v1082_v25 }
 0x4f1   :  { %v1121_v26 = vpop.f32.mrf.mxu0 }
 0x4f2   :  { %v1122_v4 = vadd.f32 %v2164_v9, %v1121_v26 }
 0x4f4   :  { %v1220_v16 = vrot.slane %v1122_v4, 1 }
 0x4f6   :  { %v1095_v30 = vpop.f32.mrf.mxu2  ;;  %v1108_v32 = vpop.f32.mrf.mxu3 }
 0x4f7   :  { %v1128_v34 = vrot.slane %v1095_v30, 1  ;;  %v1131_v35 = vadd.f32 %v1125_v28, %v1095_v30  ;;  %v1174_v36 = vrot.slane %v1108_v32, 1  ;;  %v1177_v37 = vadd.f32 %v1171_v29, %v1108_v32 }
 0x4f9   :  { %v1132_v7 = vadd.f32 %v1128_v34, %v1126_v31  ;;  %v1500_v41 = vmul.f32 -1.442695, %v1131_v35  ;;  %v1178_v42 = vadd.f32 %v1174_v36, %v1172_v33  ;;  %v1502_v43 = vmul.f32 -1.442695, %v1177_v37  ;;  %v1123_v44 = vpop.f32.mrf.mxu0 }
 0x4fb   :  { %1639 = vpow2.f32 %v1500_v41  ;;  %v1501_v45 = vmul.f32 -1.442695, %v1132_v7  ;;  %v1503_v46 = vmul.f32 -1.442695, %v1178_v42 }
 0x4fc   :  { %1641 = vpow2.f32 %v1502_v43 }
 0x4fd   :  { %1643 = vpow2.f32 %v1501_v45 }
 0x4fe   :  { %1645 = vpow2.f32 %v1503_v46  ;;  %v1097_v47 = vpop.f32.mrf.mxu2  ;;  %v1110_v48 = vpop.f32.mrf.mxu3 }
 0x501   :  { %v1640_v49 = vpop.eup %1639 }
 0x502   :  { %v1642_v50 = vpop.eup %1641  ;;  %v1139_v51 = vadd.f32 1.0, %v1640_v49 }
 0x503   :  { %v1644_v52 = vpop.eup %1643  ;;  %v2296_v38 = vadd.f32 1.0, %v1642_v50 }
 0x504   :  { %v1646_v18 = vpop.eup %1645  ;;  %v1140_v17 = vadd.f32 1.0, %v1644_v52  ;;  %1647 = vrcp.f32 %v1139_v51  ;;  %v1152_v3 = vand.u32 2147483648, %v1139_v51  ;;  %v1150_v2 = vand.u32 2147483647, %v1139_v51 }
 0x505   :  { %v2298_v40 = vadd.f32 1.0, %v1646_v18  ;;  %1649 = vrcp.f32 %v2296_v38  ;;  %vm1146_vm2 = vweird.f32 %v1139_v51  ;;  %v1198_v31 = vand.u32 2147483648, %v2296_v38 }
 0x506   :  { %1651 = vrcp.f32 %v1140_v17  ;;  %v1167_v24 = vand.u32 2147483648, %v1140_v17  ;;  %v1165_v8 = vand.u32 2147483647, %v1140_v17  ;;  %v1153_v10 = vor.u32 1.1754944e-38, %v1152_v3  ;;  %v1334_v3 = vld [vmem:[%s2405_s1 + $0x7] sm:$0x1] }
 0x507   :  { %1653 = vrcp.f32 %v2298_v40  ;;  %vm1151_vm6 = vcmp.eq.f32.partialorder %v1150_v2, 8.507059e+37  ;;  %vm1161_vm7 = vweird.f32 %v1140_v17  ;;  %vm1192_vm11 = vweird.f32 %v2296_v38  ;;  %v1335_v2 = vld [vmem:[%s2405_s1 + $0xf] sm:$0x1] }
 0x508   :  { %v1168_v15 = vor.u32 1.1754944e-38, %v1167_v24  ;;  %vm1166_vm9 = vcmp.eq.f32.partialorder %v1165_v8, 8.507059e+37  ;;  %v1196_v32 = vand.u32 2147483647, %v2296_v38  ;;  %v1213_v34 = vand.u32 2147483648, %v2298_v40 }
 0x509   :  { %v1211_v36 = vand.u32 2147483647, %v2298_v40  ;;  %v1199_v7 = vor.u32 1.1754944e-38, %v1198_v31 }
 0x50a   :  { %v1648_v56 = vpop.eup %1647  ;;  %v1214_v45 = vor.u32 1.1754944e-38, %v1213_v34 }
 0x50b   :  { %v2302_v57 = vpop.eup %1649  ;;  %v1142_v58 = vmul.f32 %v1648_v56, %v1139_v51  ;;  %vm1147_vm14 = vweird.f32 %v1648_v56 }
 0x50c   :  { %v1652_v59 = vpop.eup %1651  ;;  %v1188_v63 = vmul.f32 %v2302_v57, %v2296_v38  ;;  %vm1148_vm4 = vmor %vm1146_vm2, %vm1147_vm14  ;;  %vm1193_vm10 = vweird.f32 %v2302_v57  ;;  %vm1207_vm14 = vweird.f32 %v2298_v40 }
 0x50d   :  { %v1143_v60 = vsub.f32 1.0, %v1142_v58  ;;  %v1157_v61 = vmul.f32 %v1652_v59, %v1140_v17  ;;  %v2304_v62 = vpop.eup %1653  ;;  %vm1162_vm3 = vweird.f32 %v1652_v59  ;;  %vm1194_vm13 = vmor %vm1192_vm11, %vm1193_vm10  ;;  %v1289_v58 = vld [vmem:[%s2404_s0 + $0xf] sm:$0x1] }
 0x50e   :  { %v1203_v5 = vmul.f32 %v2304_v62, %v2298_v40  ;;  %v1189_v11 = vsub.f32 1.0, %v1188_v63  ;;  %vm1163_vm8 = vmor %vm1161_vm7, %vm1162_vm3  ;;  %vm1208_vm12 = vweird.f32 %v2304_v62  ;;  %vm1197_vm3 = vcmp.eq.f32.partialorder %v1196_v32, 8.507059e+37 }
 0x50f   :  { %v1144_v0 = vmul.f32 %v1648_v56, %v1143_v60  ;;  %v1158_v1 = vsub.f32 1.0, %v1157_v61  ;;  %vm1209_vm2 = vmor %vm1207_vm14, %vm1208_vm12 }
 0x510   :  { %v1204_v54 = vsub.f32 1.0, %v1203_v5  ;;  %v1190_v23 = vmul.f32 %v2302_v57, %v1189_v11 }
 0x511   :  { %v1145_v27 = vadd.f32 %v1648_v56, %v1144_v0  ;;  %v1159_v6 = vmul.f32 %v1652_v59, %v1158_v1 }
 0x512   :  { %v1205_v28 = vmul.f32 %v2304_v62, %v1204_v54  ;;  %v1191_v30 = vadd.f32 %v2302_v57, %v1190_v23 }
 0x513   :  { %v1149_v12 = vsel %vm1148_vm4, %v1648_v56, %v1145_v27  ;;  %v1160_v13 = vadd.f32 %v1652_v59, %v1159_v6  ;;  %vm1212_vm4 = vcmp.eq.f32.partialorder %v1211_v36, 8.507059e+37  ;;  %v1288_v56 = vld [vmem:[%s2404_s0 + $0x7] sm:$0x1] }
 0x514   :  { %v1154_v14 = vsel %vm1151_vm6, %v1153_v10, %v1149_v12  ;;  %v1206_v33 = vadd.f32 %v2304_v62, %v1205_v28  ;;  %v1195_v35 = vsel %vm1194_vm13, %v2302_v57, %v1191_v30 }
 0x515   :  { %v1164_v55 = vsel %vm1163_vm8, %v1652_v59, %v1160_v13  ;;  %v1223_v20 = vmul.f32 %v1154_v14, %v1122_v4  ;;  %v1200_v44 = vsel %vm1197_vm3, %v1199_v7, %v1195_v35 }
 0x516   :  { %v1169_v21 = vsel %vm1166_vm9, %v1168_v15, %v1164_v55  ;;  %v1210_v41 = vsel %vm1209_vm2, %v2304_v62, %v1206_v33 }
 0x517   :  { %v1224_v25 = vmul.f32 %v1220_v16, %v1169_v21  ;;  %v1225_v26 = vadd.f32 %v1223_v20, %v1217_v39  ;;  %v1215_v48 = vsel %vm1212_vm4, %v1214_v45, %v1210_v41 }
 0x519   :  { %v1226_v29 = vadd.f32 %v1224_v25, %v1218_v22  ;;  %1655 = vtanh.f32 %v1225_v26 }
 0x51b   :  { %1657 = vtanh.f32 %v1226_v29 }
 0x51f   :  { %v1656_v37 = vpop.eup %1655 }
 0x520   :  { %v1229_v42 = vsub.f32 %v2262_v53, %v1656_v37 }
 0x521   :  { %v1658_v43 = vpop.eup %1657 }
 0x522   :  { %v1230_v46 = vsub.f32 %v2264_v19, %v1658_v43  ;;  %v1231_v47 = vmul.f32 %v1229_v42, %v1200_v44 }
 0x524   :  { %v1232_v49 = vmul.f32 %v1230_v46, %v1215_v48  ;;  %v2333_v50 = vadd.f32 %v1656_v37, %v1231_v47  ;;  %v1380_v47 = vld [vmem:[%s2406_s2 + $0x7] sm:$0x1] }
 0x526   :  { %v2335_v51 = vadd.f32 %v1658_v43, %v1232_v49  ;;  %1235 = vst.msk [vmem:[%s2412_s8 + $0x6] sm:$0x1] %vm256_vm5, %v2333_v50  ;;  %v1237_v53 = vpack.c.bf16 %v2333_v50, %v2333_v50 }
 0x528   :  { %1236 = vst.msk [vmem:[%s2412_s8 + $0xe] sm:$0x1] %vm256_vm5, %v2335_v51  ;;  %v1238_v19 = vpack.c.bf16 %v2335_v51, %v2335_v51  ;;  %v1241_v38 = vunpack.c.l.b16 %v1237_v53 }
 0x52a   :  { %v1242_v52 = vunpack.c.l.b16 %v1238_v19 }
 0x52c   :  { %v1243_v18 = vrot.slane %v1242_v52, 7 }
 0x52e   :  { %v1244_v17 = vsel %vm244_vm15, %v1243_v18, %v1241_v38  ;;  %v1381_v18 = vld [vmem:[%s2406_s2 + $0xf] sm:$0x1] }
 0x52f   :  { %v1245_v40 = vpack.c.b16 %v1244_v17, %v1244_v17 }
 0x531   :  { %1504 = vmatmul.msk.bf16.vlgmr.msrb.gmra.mxu1 %vm67_vm1, %v1245_v40  ;;  %1505 = vmatmul.msk.bf16.vlgmr.msrb.gmra.mxu2 %vm67_vm1, %v1245_v40 }
 0x532   :  { %1506 = vmatmul.msk.bf16.vlgmr.msrb.gmra.mxu3 %vm67_vm1, %v1245_v40 }
 0x5ae   :  { %v1258_v57 = vpop.f32.mrf.mxu1 }
 0x5af   :  { %v1291_v59 = vrot.slane %v1258_v57, 1  ;;  %v1294_v60 = vadd.f32 %v1288_v56, %v1258_v57 }
 0x5b1   :  { %v1295_v61 = vadd.f32 %v1291_v59, %v1289_v58  ;;  %v1507_v62 = vmul.f32 -1.442695, %v1294_v60 }
 0x5b3   :  { %1659 = vpow2.f32 %v1507_v62  ;;  %v1508_v63 = vmul.f32 -1.442695, %v1295_v61 }
 0x5b4   :  { %v1271_v0 = vpop.f32.mrf.mxu2 }
 0x5b5   :  { %1661 = vpow2.f32 %v1508_v63  ;;  %v1337_v1 = vrot.slane %v1271_v0, 1  ;;  %v1340_v4 = vadd.f32 %v1334_v3, %v1271_v0  ;;  %v1284_v24 = vpop.f32.mrf.mxu3 }
 0x5b6   :  { %v1260_v5 = vpop.f32.mrf.mxu1  ;;  %v1285_v32 = vadd.f32 %v2164_v9, %v1284_v24 }
 0x5b7   :  { %v1341_v27 = vadd.f32 %v1337_v1, %v1335_v2  ;;  %v1509_v6 = vmul.f32 -1.442695, %v1340_v4 }
 0x5b8   :  { %v1383_v48 = vrot.slane %v1285_v32, 1 }
 0x5b9   :  { %v1660_v8 = vpop.eup %1659  ;;  %1663 = vpow2.f32 %v1509_v6  ;;  %v1510_v10 = vmul.f32 -1.442695, %v1341_v27 }
 0x5ba   :  { %v1302_v11 = vadd.f32 1.0, %v1660_v8 }
 0x5bb   :  { %v1662_v12 = vpop.eup %1661  ;;  %1665 = vpow2.f32 %v1510_v10 }
 0x5bc   :  { %v1303_v13 = vadd.f32 1.0, %v1662_v12  ;;  %1667 = vrcp.f32 %v1302_v11  ;;  %v1273_v14 = vpop.f32.mrf.mxu2  ;;  %v1313_v26 = vand.u32 2147483647, %v1302_v11  ;;  %v1315_v28 = vand.u32 2147483648, %v1302_v11 }
 0x5bd   :  { %v1286_v15 = vpop.f32.mrf.mxu3  ;;  %vm1309_vm6 = vweird.f32 %v1302_v11 }
 0x5be   :  { %1669 = vrcp.f32 %v1303_v13  ;;  %v1328_v33 = vand.u32 2147483647, %v1303_v13  ;;  %v1330_v34 = vand.u32 2147483648, %v1303_v13  ;;  %vm1314_vm9 = vcmp.eq.f32.partialorder %v1313_v26, 8.507059e+37 }
 0x5bf   :  { %v1664_v39 = vpop.eup %1663  ;;  %v1316_v41 = vor.u32 1.1754944e-38, %v1315_v28  ;;  %vm1324_vm10 = vweird.f32 %v1303_v13 }
 0x5c0   :  { %v2367_v54 = vadd.f32 1.0, %v1664_v39  ;;  %v1331_v9 = vor.u32 1.1754944e-38, %v1330_v34  ;;  %vm1329_vm12 = vcmp.eq.f32.partialorder %v1328_v33, 8.507059e+37 }
 0x5c1   :  { %v1666_v16 = vpop.eup %1665 }
 0x5c2   :  { %v1668_v55 = vpop.eup %1667  ;;  %v2369_v20 = vadd.f32 1.0, %v1666_v16  ;;  %1671 = vrcp.f32 %v2367_v54  ;;  %v1361_v59 = vand.u32 2147483648, %v2367_v54  ;;  %vm1355_vm14 = vweird.f32 %v2367_v54 }
 0x5c3   :  { %v1305_v21 = vmul.f32 %v1668_v55, %v1302_v11  ;;  %vm1310_vm1 = vweird.f32 %v1668_v55  ;;  %v1359_v60 = vand.u32 2147483647, %v2367_v54 }
 0x5c4   :  { %v1670_v22 = vpop.eup %1669  ;;  %1673 = vrcp.f32 %v2369_v20  ;;  %vm1311_vm8 = vmor %vm1309_vm6, %vm1310_vm1  ;;  %v1376_v62 = vand.u32 2147483648, %v2369_v20  ;;  %vm1370_vm4 = vweird.f32 %v2369_v20  ;;  %v1374_v63 = vand.u32 2147483647, %v2369_v20 }
 0x5c5   :  { %v1306_v23 = vsub.f32 1.0, %v1305_v21  ;;  %v1320_v25 = vmul.f32 %v1670_v22, %v1303_v13  ;;  %vm1325_vm7 = vweird.f32 %v1670_v22  ;;  %v1362_v2 = vor.u32 1.1754944e-38, %v1361_v59 }
 0x5c6   :  { %vm1326_vm11 = vmor %vm1324_vm10, %vm1325_vm7  ;;  %vm1360_vm6 = vcmp.eq.f32.partialorder %v1359_v60, 8.507059e+37  ;;  %v1377_v27 = vor.u32 1.1754944e-38, %v1376_v62  ;;  %vm1375_vm7 = vcmp.eq.f32.partialorder %v1374_v63, 8.507059e+37 }
 0x5c7   :  { %v1307_v29 = vmul.f32 %v1668_v55, %v1306_v23  ;;  %v1321_v30 = vsub.f32 1.0, %v1320_v25 }
 0x5c8   :  { %v1672_v31 = vpop.eup %1671 }
 0x5c9   :  { %v1351_v35 = vmul.f32 %v1672_v31, %v2367_v54  ;;  %v1308_v36 = vadd.f32 %v1668_v55, %v1307_v29  ;;  %v1322_v37 = vmul.f32 %v1670_v22, %v1321_v30  ;;  %vm1356_vm13 = vweird.f32 %v1672_v31 }
 0x5ca   :  { %v1674_v7 = vpop.eup %1673  ;;  %vm1357_vm3 = vmor %vm1355_vm14, %vm1356_vm13 }
 0x5cb   :  { %v1352_v42 = vsub.f32 1.0, %v1351_v35  ;;  %v1366_v43 = vmul.f32 %v1674_v7, %v2369_v20  ;;  %v1312_v44 = vsel %vm1311_vm8, %v1668_v55, %v1308_v36  ;;  %v1323_v45 = vadd.f32 %v1670_v22, %v1322_v37 }
 0x5cc   :  { %v1317_v46 = vsel %vm1314_vm9, %v1316_v41, %v1312_v44  ;;  %vm1371_vm2 = vweird.f32 %v1674_v7 }
 0x5cd   :  { %v1367_v49 = vsub.f32 1.0, %v1366_v43  ;;  %v1327_v53 = vsel %vm1326_vm11, %v1670_v22, %v1323_v45  ;;  %v1386_v19 = vmul.f32 %v1317_v46, %v1285_v32  ;;  %v1353_v52 = vmul.f32 %v1672_v31, %v1352_v42  ;;  %vm1372_vm1 = vmor %vm1370_vm4, %vm1371_vm2 }
 0x5ce   :  { %v1332_v38 = vsel %vm1329_vm12, %v1331_v9, %v1327_v53 }
 0x5cf   :  { %v1387_v17 = vmul.f32 %v1383_v48, %v1332_v38  ;;  %v1388_v40 = vadd.f32 %v1386_v19, %v1380_v47  ;;  %v1368_v56 = vmul.f32 %v1674_v7, %v1367_v49  ;;  %v1354_v58 = vadd.f32 %v1672_v31, %v1353_v52 }
 0x5d1   :  { %v1389_v57 = vadd.f32 %v1387_v17, %v1381_v18  ;;  %1675 = vtanh.f32 %v1388_v40  ;;  %v1369_v61 = vadd.f32 %v1674_v7, %v1368_v56  ;;  %v1358_v3 = vsel %vm1357_vm3, %v1672_v31, %v1354_v58 }
 0x5d2   :  { %v1363_v5 = vsel %vm1360_vm6, %v1362_v2, %v1358_v3 }
 0x5d3   :  { %1677 = vtanh.f32 %v1389_v57  ;;  %v1373_v4 = vsel %vm1372_vm1, %v1674_v7, %v1369_v61 }
 0x5d4   :  { %v1378_v10 = vsel %vm1375_vm7, %v1377_v27, %v1373_v4 }
 0x5d7   :  { %v1676_v0 = vpop.eup %1675 }
 0x5d8   :  { %v1392_v1 = vsub.f32 %v2333_v50, %v1676_v0 }
 0x5d9   :  { %v1678_v24 = vpop.eup %1677 }
 0x5da   :  { %v1393_v6 = vsub.f32 %v2335_v51, %v1678_v24  ;;  %v1394_v8 = vmul.f32 %v1392_v1, %v1363_v5 }
 0x5dc   :  { %v1395_v11 = vmul.f32 %v1393_v6, %v1378_v10  ;;  %v1396_v12 = vadd.f32 %v1676_v0, %v1394_v8 }
 0x5de   :  { %v1397_v13 = vadd.f32 %v1678_v24, %v1395_v11  ;;  %1398 = vst.msk [vmem:[%s2412_s8 + $0x7] sm:$0x1] %vm256_vm5, %v1396_v12 }
 0x5e0   :  { %1399 = vst.msk [vmem:[%s2412_s8 + $0xf] sm:$0x1] %vm256_vm5, %v1397_v13  ;;  %v1402_v50 = vrot.slane %v1397_v13, 7 }
 0x5e2   :  { %v1403_v51 = vsel %vm244_vm15, %v1402_v50, %v1396_v12 }
 0x5e3   :  { %1406 = vst.msk [vmem:[#allocation2] sm:$0x3] %vm38_vm0, %v1403_v51 }
 0x5e4   :  { %1410 = vst.msk [vmem:[#allocation3] sm:$0x3] %vm38_vm0, %v1403_v51 }
 0x5e5   :  { %1423 = dma.vmem_to_hbm [thread:$0]  %s1419_s7, 32, %s1421_s21, [#allocation4]  }
 0x5e6   :  { %1710 = dma.done.wait [#allocation4], 32  }
 0x5e7   :  { %1711 = vsyncadd [#allocation4], 4294967264 }
 0x5e8   :  { %1430 = vsyncpa [#allocation4], 1 }

</bundles_post_ra>
